<compile_context>
chip_gen: v7x
topology: tpu7x:2x2x1
jax: 0.10.0
libtpu: 0.0.40
codegen_flags: <defaults>
</compile_context>

<pallas_src>
import functools

import numpy as np
import jax
import jax.numpy as jnp
from jax.experimental import pallas as pl
from jax.experimental.pallas import tpu as pltpu

NUM_ATOMS = 14
ATOMS_BB = ["N", "CA", "C", "O"]
AA20 = "ACDEFGHIKLMNPQRSTVWY"
AA_SIDECHAIN_ATOMS = {
    "A": ["CB"],
    "C": ["CB", "SG"],
    "D": ["CB", "CG", "OD1", "OD2"],
    "E": ["CB", "CG", "CD", "OE1", "OE2"],
    "F": ["CB", "CG", "CD1", "CD2", "CE1", "CE2", "CZ"],
    "G": [],
    "H": ["CB", "CG", "ND1", "CD2", "CE1", "NE2"],
    "I": ["CB", "CG1", "CG2", "CD1"],
    "K": ["CB", "CG", "CD", "CE", "NZ"],
    "L": ["CB", "CG", "CD1", "CD2"],
    "M": ["CB", "CG", "SD", "CE"],
    "N": ["CB", "CG", "OD1", "ND2"],
    "P": ["CB", "CG", "CD"],
    "Q": ["CB", "CG", "CD", "OE1", "NE2"],
    "R": ["CB", "CG", "CD", "NE", "CZ", "NH1", "NH2"],
    "S": ["CB", "OG"],
    "T": ["CB", "OG1", "CG2"],
    "V": ["CB", "CG1", "CG2"],
    "W": ["CB", "CG", "CD1", "CD2", "NE1", "CE2", "CE3", "CZ2", "CZ3", "CH2"],
    "Y": ["CB", "CG", "CD1", "CD2", "CE1", "CE2", "CZ", "OH"],
}
VDW_RADII = {"C": 1.7, "N": 1.55, "O": 1.52, "S": 1.8}


def _build_constants():
    """Deterministic stand-ins for constants.AA20_NUM_ATOMS and the vdw table."""
    atoms_per_aa = np.zeros((20,), np.int32)
    radii = np.zeros((20, NUM_ATOMS), np.float32)
    for i, aa in enumerate(AA20):
        atoms = ATOMS_BB + AA_SIDECHAIN_ATOMS[aa]
        atoms_per_aa[i] = len(atoms)
        for j, name in enumerate(atoms):
            radii[i, j] = VDW_RADII[name[0]]
    return jnp.asarray(atoms_per_aa), jnp.asarray(radii)


AA20_NUM_ATOMS, AA20_VDW_RADII = _build_constants()


def _round_up(x, m):
    return ((x + m - 1) // m) * m


# ----------------------------- plain-JAX glue ------------------------------ #
def atom_mask(C, S):
    """(B, N) chain map + tokens -> (B, N, 14) per-atom validity mask."""
    atoms_per_res = AA20_NUM_ATOMS[S].astype(jnp.float32)
    atoms_per_res = (C > 0).astype(jnp.float32) * atoms_per_res
    ix = jnp.arange(NUM_ATOMS, dtype=jnp.float32)[None, None, :]
    return (ix < atoms_per_res[..., None]).astype(jnp.float32)


def collect_neighbors(node_h, edge_idx):
    """node_h (B, N, F), edge_idx (B, N, K) -> (B, N, K, F)."""
    B, N, F = node_h.shape
    K = edge_idx.shape[-1]
    idx = edge_idx.reshape(B, N * K, 1)
    return jnp.take_along_axis(node_h, idx, axis=1).reshape(B, N, K, F)


# ------------------------------ Pallas kernel ------------------------------ #
def _clash_kernel(i_ref, j_ref, o_ref, *, A, KA, distance_eps,
                  use_smooth_cutoff, smooth_cutoff_alpha):
    # i_ref: (1, TN, 5*A)   packed [x, y, z, mask_i, 0.5*r_i]
    # j_ref: (1, TN, 5*KA)  packed [xj, yj, zj, mask_j*mask_ne, 0.5*r_j + cc]
    # o_ref: (1, 1, TN)
    TN = o_ref.shape[-1]
    acc = jnp.zeros((TN, 1), jnp.float32)

    # Static unrolled loop over sidechain atoms of residue i (a >= 4); this
    # reproduces the bond_clash[:, :, :, 4:, :] slice of the reference.
    for a in range(4, A):
        xi = i_ref[0, :, 0 * A + a:0 * A + a + 1]   # (TN, 1)
        yi = i_ref[0, :, 1 * A + a:1 * A + a + 1]
        zi = i_ref[0, :, 2 * A + a:2 * A + a + 1]
        mi = i_ref[0, :, 3 * A + a:3 * A + a + 1]
        ci = i_ref[0, :, 4 * A + a:4 * A + a + 1]

        xj = j_ref[0, :, 0 * KA:1 * KA]             # (TN, KA)
        yj = j_ref[0, :, 1 * KA:2 * KA]
        zj = j_ref[0, :, 2 * KA:3 * KA]
        mj = j_ref[0, :, 3 * KA:4 * KA]
        cj = j_ref[0, :, 4 * KA:5 * KA]

        dx = xi - xj
        dy = yi - yj
        dz = zi - zj
        d2 = dx * dx + dy * dy + dz * dz            # (TN, KA)
        cutoff = ci + cj                            # (r_i + r_j)/2 + cc
        mask = mi * mj

        if use_smooth_cutoff:
            d = jnp.sqrt(d2 + distance_eps)
            clash = mask * jax.nn.sigmoid(smooth_cutoff_alpha * (cutoff - d))
        else:
            # sqrt-free: D < cutoff  <=>  d2 + eps < cutoff^2  (cutoff > 0)
            clash = jnp.where(d2 + distance_eps < cutoff * cutoff, mask, 0.0)

        acc = acc + jnp.sum(clash, axis=-1, keepdims=True)

    o_ref[0, 0, :] = acc[:, 0]


def sidechain_clashes(X, C, S, edge_idx, mask_j=None, mask_ij=None, *,
                      distance_eps=1e-3, connect_cutoff=0.35,
                      use_smooth_cutoff=False, smooth_cutoff_alpha=1.0):
    """Pallas implementation of LossSidechainClashes.forward (edge_idx given)."""
    B, N, A, _ = X.shape
    K = edge_idx.shape[-1]

    # --- per-atom masks / vdw radii ---------------------------------------- #
    mask_atoms = atom_mask(C, S)                                    # (B, N, A)
    mask_atoms_j = mask_atoms if mask_j is None else mask_atoms * mask_j[..., None]
    mask_j_g = collect_neighbors(mask_atoms_j, edge_idx)            # (B, N, K, A)

    radii_i = AA20_VDW_RADII[S]                                     # (B, N, A)
    radii_j = collect_neighbors(radii_i, edge_idx)                  # (B, N, K, A)

    Xf = X.astype(jnp.float32)
    X_j = collect_neighbors(Xf.reshape(B, N, A * 3), edge_idx)
    X_j = X_j.reshape(B, N, K, A, 3)

    # Fold the non-self-edge mask (and optional pair mask) into the j-atom mask.
    mask_ne = (edge_idx != jnp.arange(N, dtype=edge_idx.dtype)[None, :, None])
    mask_ne = mask_ne.astype(jnp.float32)                           # (B, N, K)
    if mask_ij is not None:
        mask_ne = mask_ne * mask_ij
    mj = mask_j_g * mask_ne[..., None]                              # (B, N, K, A)

    # Pre-combine vdw constants: cutoff = 0.5*r_i + (0.5*r_j + connect_cutoff)
    ci = 0.5 * radii_i                                              # (B, N, A)
    cj = 0.5 * radii_j + connect_cutoff                             # (B, N, K, A)

    # --- packing for lane-dense kernel layout ------------------------------ #
    KA = K * A
    KA_pad = _round_up(KA, 128)
    TN = min(128, _round_up(N, 8))
    N_pad = _round_up(N, TN)

    i_pack = jnp.concatenate(
        [Xf[..., 0], Xf[..., 1], Xf[..., 2], mask_atoms, ci], axis=-1)   # (B, N, 5A)

    def flat_pad(t):  # (B, N, K, A) -> (B, N, KA_pad), zero-padded lanes
        t = t.reshape(B, N, KA)
        return jnp.pad(t, ((0, 0), (0, 0), (0, KA_pad - KA)))

    j_pack = jnp.concatenate(
        [flat_pad(X_j[..., 0]), flat_pad(X_j[..., 1]), flat_pad(X_j[..., 2]),
         flat_pad(mj), flat_pad(cj)], axis=-1)                      # (B, N, 5*KA_pad)

    if N_pad != N:  # padded residues have mask_i = 0 -> contribute nothing
        i_pack = jnp.pad(i_pack, ((0, 0), (0, N_pad - N), (0, 0)))
        j_pack = jnp.pad(j_pack, ((0, 0), (0, N_pad - N), (0, 0)))

    kernel = functools.partial(
        _clash_kernel, A=A, KA=KA_pad, distance_eps=distance_eps,
        use_smooth_cutoff=use_smooth_cutoff,
        smooth_cutoff_alpha=smooth_cutoff_alpha)

    out = pl.pallas_call(
        kernel,
        out_shape=jax.ShapeDtypeStruct((B, 1, N_pad), jnp.float32),
        grid=(B, N_pad // TN),
        in_specs=[
            pl.BlockSpec((1, TN, 5 * A), lambda b, n: (b, n, 0)),
            pl.BlockSpec((1, TN, 5 * KA_pad), lambda b, n: (b, n, 0)),
        ],
        out_specs=pl.BlockSpec((1, 1, TN), lambda b, n: (b, 0, n)),
        compiler_params=pltpu.CompilerParams(
            dimension_semantics=("parallel", "parallel")),
    )(i_pack, j_pack)
    return out[:, 0, :N]


# ------------------------------ pure-JAX reference -------------------------- #
def reference_clashes(X, C, S, edge_idx, mask_j=None, mask_ij=None, *,
                      distance_eps=1e-3, connect_cutoff=0.35,
                      use_smooth_cutoff=False, smooth_cutoff_alpha=1.0):
    B, N, A, _ = X.shape
    K = edge_idx.shape[-1]
    mask_atoms = atom_mask(C, S)
    mask_atoms_j = mask_atoms if mask_j is None else mask_atoms * mask_j[..., None]
    mask_j_g = collect_neighbors(mask_atoms_j, edge_idx)
    mask_i = jnp.broadcast_to(mask_atoms[:, :, None, :], (B, N, K, A))
    mask_D = mask_i[..., :, None] * mask_j_g[..., None, :]
    node_idx = jnp.arange(N)[None, :, None]
    mask_ne = (edge_idx != node_idx).astype(jnp.float32)
    mask_D = mask_D * mask_ne[..., None, None]
    if mask_ij is not None:
        mask_D = mask_D * mask_ij[..., None, None]
    X_flat = X.reshape(B, N, -1)
    X_j = collect_neighbors(X_flat, edge_idx).reshape(B, N, K, A, 3)
    X_i = jnp.broadcast_to(X[:, :, None, :, :], (B, N, K, A, 3))
    D = jnp.sqrt(jnp.sum((X_i[..., :, None, :] - X_j[..., None, :, :]) ** 2, -1)
                 + distance_eps)
    radii_i = AA20_VDW_RADII[S]
    radii_j = collect_neighbors(radii_i, edge_idx)
    D_vdw = radii_i[:, :, None, :, None] + radii_j[:, :, :, None, :]
    D_cut = D_vdw / 2.0 + connect_cutoff
    if use_smooth_cutoff:
        bond_clash = mask_D * jax.nn.sigmoid(smooth_cutoff_alpha * (D_cut - D))
    else:
        bond_clash = mask_D * (D < D_cut).astype(jnp.float32)
    bond_clash = bond_clash[:, :, :, 4:, :]
    return bond_clash.sum(axis=(2, 3, 4))


# ----------------------------------- test ----------------------------------- #
def _make_inputs(key, B, N, K):
    kx, ks = jax.random.split(key)
    X = jax.random.normal(kx, (B, N, NUM_ATOMS, 3), dtype=jnp.float32) * 2.0
    S = jax.random.randint(ks, (B, N), 0, 20, dtype=jnp.int32)
    C = jnp.ones((B, N), dtype=jnp.int32).at[0, 0].set(0)
    # TODO(synk): protein_graph.ProteinGraph (masked backbone kNN builder) is
    # not reproduced; build a simple CA-distance kNN graph here instead
    # (self-edges are removed inside the loss by the mask_ne term anyway).
    Xca = X[:, :, 1, :]
    D_res = jnp.sqrt(
        jnp.sum((Xca[:, :, None, :] - Xca[:, None, :, :]) ** 2, -1) + 1e-6)
    edge_idx = jnp.argsort(D_res, axis=-1)[:, :, :K].astype(jnp.int32)
    return X, C, S, edge_idx


if __name__ == "__main__":
    key = jax.random.PRNGKey(0)
    k1, k2 = jax.random.split(key)

    # 1) small shape, hard cutoff
    X, C, S, edge_idx = _make_inputs(k1, B=2, N=8, K=4)
    out = jax.block_until_ready(sidechain_clashes(X, C, S, edge_idx))
    ref = reference_clashes(X, C, S, edge_idx)
    np.testing.assert_allclose(np.asarray(out), np.asarray(ref),
                               rtol=1e-5, atol=1e-5)

    # 2) small shape, smooth (differentiable) cutoff
    out_s = jax.block_until_ready(
        sidechain_clashes(X, C, S, edge_idx,
                          use_smooth_cutoff=True, smooth_cutoff_alpha=2.0))
    ref_s = reference_clashes(X, C, S, edge_idx,
                              use_smooth_cutoff=True, smooth_cutoff_alpha=2.0)
    np.testing.assert_allclose(np.asarray(out_s), np.asarray(ref_s),
                               rtol=1e-5, atol=1e-5)

    # 3) larger shape exercising N-tiling (N_pad=256, two N tiles) and KA padding
    X2, C2, S2, edge_idx2 = _make_inputs(k2, B=1, N=200, K=8)
    out2 = jax.block_until_ready(sidechain_clashes(X2, C2, S2, edge_idx2))
    ref2 = reference_clashes(X2, C2, S2, edge_idx2)
    np.testing.assert_allclose(np.asarray(out2), np.asarray(ref2),
                               rtol=1e-5, atol=1e-5)

    print("KERNEL_OK")
</pallas_src>

<mosaic_0001>
module attributes {stable_mosaic.version = 11 : i64} {
  func.func @_clash_kernel(%arg0: i32, %arg1: i32, %arg2: memref<1x8x70xf32, #tpu.memory_space<vmem>>, %arg3: memref<1x8x640xf32, #tpu.memory_space<vmem>>, %arg4: memref<1x1x8xf32, #tpu.memory_space<vmem>>) attributes {dimension_semantics = [#tpu.dimension_semantics<parallel>, #tpu.dimension_semantics<parallel>], iteration_bounds = array<i64: 2, 1>, scalar_prefetch = 0 : i64, scratch_operands = 0 : i64, tpu.core_type = #tpu.core_type<tc>, window_params = [{transform_indices = @transform_0, window_bounds = array<i64: 1, 8, 70>}, {transform_indices = @transform_1, window_bounds = array<i64: 1, 8, 640>}, {transform_indices = @transform_2, window_bounds = array<i64: 1, 1, 8>}]} {
    %cst = arith.constant 0.000000e+00 : f32
    %0 = vector.broadcast %cst : f32 to vector<8x1xf32>
    %c0 = arith.constant 0 : index
    %c0_0 = arith.constant 0 : index
    %c4 = arith.constant 4 : index
    %1 = vector.load %arg2[%c0, %c0_0, %c4] : memref<1x8x70xf32, #tpu.memory_space<vmem>>, vector<1x8x1xf32>
    %2 = vector.shape_cast %1 : vector<1x8x1xf32> to vector<8x1xf32>
    %c0_1 = arith.constant 0 : index
    %c0_2 = arith.constant 0 : index
    %c18 = arith.constant 18 : index
    %3 = vector.load %arg2[%c0_1, %c0_2, %c18] : memref<1x8x70xf32, #tpu.memory_space<vmem>>, vector<1x8x1xf32>
    %4 = vector.shape_cast %3 : vector<1x8x1xf32> to vector<8x1xf32>
    %c0_3 = arith.constant 0 : index
    %c0_4 = arith.constant 0 : index
    %c32 = arith.constant 32 : index
    %5 = vector.load %arg2[%c0_3, %c0_4, %c32] : memref<1x8x70xf32, #tpu.memory_space<vmem>>, vector<1x8x1xf32>
    %6 = vector.shape_cast %5 : vector<1x8x1xf32> to vector<8x1xf32>
    %c0_5 = arith.constant 0 : index
    %c0_6 = arith.constant 0 : index
    %c46 = arith.constant 46 : index
    %7 = vector.load %arg2[%c0_5, %c0_6, %c46] : memref<1x8x70xf32, #tpu.memory_space<vmem>>, vector<1x8x1xf32>
    %8 = vector.shape_cast %7 : vector<1x8x1xf32> to vector<8x1xf32>
    %c0_7 = arith.constant 0 : index
    %c0_8 = arith.constant 0 : index
    %c60 = arith.constant 60 : index
    %9 = vector.load %arg2[%c0_7, %c0_8, %c60] : memref<1x8x70xf32, #tpu.memory_space<vmem>>, vector<1x8x1xf32>
    %10 = vector.shape_cast %9 : vector<1x8x1xf32> to vector<8x1xf32>
    %c0_9 = arith.constant 0 : index
    %c0_10 = arith.constant 0 : index
    %c0_11 = arith.constant 0 : index
    %11 = vector.load %arg3[%c0_9, %c0_10, %c0_11] : memref<1x8x640xf32, #tpu.memory_space<vmem>>, vector<1x8x128xf32>
    %12 = vector.shape_cast %11 : vector<1x8x128xf32> to vector<8x128xf32>
    %c0_12 = arith.constant 0 : index
    %c0_13 = arith.constant 0 : index
    %c128 = arith.constant 128 : index
    %13 = vector.load %arg3[%c0_12, %c0_13, %c128] : memref<1x8x640xf32, #tpu.memory_space<vmem>>, vector<1x8x128xf32>
    %14 = vector.shape_cast %13 : vector<1x8x128xf32> to vector<8x128xf32>
    %c0_14 = arith.constant 0 : index
    %c0_15 = arith.constant 0 : index
    %c256 = arith.constant 256 : index
    %15 = vector.load %arg3[%c0_14, %c0_15, %c256] : memref<1x8x640xf32, #tpu.memory_space<vmem>>, vector<1x8x128xf32>
    %16 = vector.shape_cast %15 : vector<1x8x128xf32> to vector<8x128xf32>
    %c0_16 = arith.constant 0 : index
    %c0_17 = arith.constant 0 : index
    %c384 = arith.constant 384 : index
    %17 = vector.load %arg3[%c0_16, %c0_17, %c384] : memref<1x8x640xf32, #tpu.memory_space<vmem>>, vector<1x8x128xf32>
    %18 = vector.shape_cast %17 : vector<1x8x128xf32> to vector<8x128xf32>
    %c0_18 = arith.constant 0 : index
    %c0_19 = arith.constant 0 : index
    %c512 = arith.constant 512 : index
    %19 = vector.load %arg3[%c0_18, %c0_19, %c512] : memref<1x8x640xf32, #tpu.memory_space<vmem>>, vector<1x8x128xf32>
    %20 = vector.shape_cast %19 : vector<1x8x128xf32> to vector<8x128xf32>
    %21 = vector.broadcast %2 : vector<8x1xf32> to vector<8x128xf32>
    %22 = arith.subf %21, %12 : vector<8x128xf32>
    %23 = vector.broadcast %4 : vector<8x1xf32> to vector<8x128xf32>
    %24 = arith.subf %23, %14 : vector<8x128xf32>
    %25 = vector.broadcast %6 : vector<8x1xf32> to vector<8x128xf32>
    %26 = arith.subf %25, %16 : vector<8x128xf32>
    %27 = arith.mulf %22, %22 : vector<8x128xf32>
    %28 = arith.mulf %24, %24 : vector<8x128xf32>
    %29 = arith.addf %27, %28 : vector<8x128xf32>
    %30 = arith.mulf %26, %26 : vector<8x128xf32>
    %31 = arith.addf %29, %30 : vector<8x128xf32>
    %32 = vector.broadcast %10 : vector<8x1xf32> to vector<8x128xf32>
    %33 = arith.addf %32, %20 : vector<8x128xf32>
    %34 = vector.broadcast %8 : vector<8x1xf32> to vector<8x128xf32>
    %35 = arith.mulf %34, %18 : vector<8x128xf32>
    %cst_20 = arith.constant 1.000000e-03 : f32
    %36 = vector.broadcast %cst_20 : f32 to vector<8x128xf32>
    %37 = arith.addf %31, %36 : vector<8x128xf32>
    %38 = arith.mulf %33, %33 : vector<8x128xf32>
    %39 = arith.cmpf olt, %37, %38 : vector<8x128xf32>
    %cst_21 = arith.constant 0.000000e+00 : f32
    %40 = vector.broadcast %cst_21 : f32 to vector<8x128xf32>
    %41 = arith.select %39, %35, %40 : vector<8x128xi1>, vector<8x128xf32>
    %cst_22 = arith.constant dense<0.000000e+00> : vector<8xf32>
    %42 = vector.multi_reduction <add>, %41, %cst_22 [1] : vector<8x128xf32> to vector<8xf32>
    %43 = vector.shape_cast %42 : vector<8xf32> to vector<8x1xf32>
    %44 = arith.addf %0, %43 : vector<8x1xf32>
    %c0_23 = arith.constant 0 : index
    %c0_24 = arith.constant 0 : index
    %c5 = arith.constant 5 : index
    %45 = vector.load %arg2[%c0_23, %c0_24, %c5] : memref<1x8x70xf32, #tpu.memory_space<vmem>>, vector<1x8x1xf32>
    %46 = vector.shape_cast %45 : vector<1x8x1xf32> to vector<8x1xf32>
    %c0_25 = arith.constant 0 : index
    %c0_26 = arith.constant 0 : index
    %c19 = arith.constant 19 : index
    %47 = vector.load %arg2[%c0_25, %c0_26, %c19] : memref<1x8x70xf32, #tpu.memory_space<vmem>>, vector<1x8x1xf32>
    %48 = vector.shape_cast %47 : vector<1x8x1xf32> to vector<8x1xf32>
    %c0_27 = arith.constant 0 : index
    %c0_28 = arith.constant 0 : index
    %c33 = arith.constant 33 : index
    %49 = vector.load %arg2[%c0_27, %c0_28, %c33] : memref<1x8x70xf32, #tpu.memory_space<vmem>>, vector<1x8x1xf32>
    %50 = vector.shape_cast %49 : vector<1x8x1xf32> to vector<8x1xf32>
    %c0_29 = arith.constant 0 : index
    %c0_30 = arith.constant 0 : index
    %c47 = arith.constant 47 : index
    %51 = vector.load %arg2[%c0_29, %c0_30, %c47] : memref<1x8x70xf32, #tpu.memory_space<vmem>>, vector<1x8x1xf32>
    %52 = vector.shape_cast %51 : vector<1x8x1xf32> to vector<8x1xf32>
    %c0_31 = arith.constant 0 : index
    %c0_32 = arith.constant 0 : index
    %c61 = arith.constant 61 : index
    %53 = vector.load %arg2[%c0_31, %c0_32, %c61] : memref<1x8x70xf32, #tpu.memory_space<vmem>>, vector<1x8x1xf32>
    %54 = vector.shape_cast %53 : vector<1x8x1xf32> to vector<8x1xf32>
    %c0_33 = arith.constant 0 : index
    %c0_34 = arith.constant 0 : index
    %c0_35 = arith.constant 0 : index
    %55 = vector.load %arg3[%c0_33, %c0_34, %c0_35] : memref<1x8x640xf32, #tpu.memory_space<vmem>>, vector<1x8x128xf32>
    %56 = vector.shape_cast %55 : vector<1x8x128xf32> to vector<8x128xf32>
    %c0_36 = arith.constant 0 : index
    %c0_37 = arith.constant 0 : index
    %c128_38 = arith.constant 128 : index
    %57 = vector.load %arg3[%c0_36, %c0_37, %c128_38] : memref<1x8x640xf32, #tpu.memory_space<vmem>>, vector<1x8x128xf32>
    %58 = vector.shape_cast %57 : vector<1x8x128xf32> to vector<8x128xf32>
    %c0_39 = arith.constant 0 : index
    %c0_40 = arith.constant 0 : index
    %c256_41 = arith.constant 256 : index
    %59 = vector.load %arg3[%c0_39, %c0_40, %c256_41] : memref<1x8x640xf32, #tpu.memory_space<vmem>>, vector<1x8x128xf32>
    %60 = vector.shape_cast %59 : vector<1x8x128xf32> to vector<8x128xf32>
    %c0_42 = arith.constant 0 : index
    %c0_43 = arith.constant 0 : index
    %c384_44 = arith.constant 384 : index
    %61 = vector.load %arg3[%c0_42, %c0_43, %c384_44] : memref<1x8x640xf32, #tpu.memory_space<vmem>>, vector<1x8x128xf32>
    %62 = vector.shape_cast %61 : vector<1x8x128xf32> to vector<8x128xf32>
    %c0_45 = arith.constant 0 : index
    %c0_46 = arith.constant 0 : index
    %c512_47 = arith.constant 512 : index
    %63 = vector.load %arg3[%c0_45, %c0_46, %c512_47] : memref<1x8x640xf32, #tpu.memory_space<vmem>>, vector<1x8x128xf32>
    %64 = vector.shape_cast %63 : vector<1x8x128xf32> to vector<8x128xf32>
    %65 = vector.broadcast %46 : vector<8x1xf32> to vector<8x128xf32>
    %66 = arith.subf %65, %56 : vector<8x128xf32>
    %67 = vector.broadcast %48 : vector<8x1xf32> to vector<8x128xf32>
    %68 = arith.subf %67, %58 : vector<8x128xf32>
    %69 = vector.broadcast %50 : vector<8x1xf32> to vector<8x128xf32>
    %70 = arith.subf %69, %60 : vector<8x128xf32>
    %71 = arith.mulf %66, %66 : vector<8x128xf32>
    %72 = arith.mulf %68, %68 : vector<8x128xf32>
    %73 = arith.addf %71, %72 : vector<8x128xf32>
    %74 = arith.mulf %70, %70 : vector<8x128xf32>
    %75 = arith.addf %73, %74 : vector<8x128xf32>
    %76 = vector.broadcast %54 : vector<8x1xf32> to vector<8x128xf32>
    %77 = arith.addf %76, %64 : vector<8x128xf32>
    %78 = vector.broadcast %52 : vector<8x1xf32> to vector<8x128xf32>
    %79 = arith.mulf %78, %62 : vector<8x128xf32>
    %cst_48 = arith.constant 1.000000e-03 : f32
    %80 = vector.broadcast %cst_48 : f32 to vector<8x128xf32>
    %81 = arith.addf %75, %80 : vector<8x128xf32>
    %82 = arith.mulf %77, %77 : vector<8x128xf32>
    %83 = arith.cmpf olt, %81, %82 : vector<8x128xf32>
    %cst_49 = arith.constant 0.000000e+00 : f32
    %84 = vector.broadcast %cst_49 : f32 to vector<8x128xf32>
    %85 = arith.select %83, %79, %84 : vector<8x128xi1>, vector<8x128xf32>
    %cst_50 = arith.constant dense<0.000000e+00> : vector<8xf32>
    %86 = vector.multi_reduction <add>, %85, %cst_50 [1] : vector<8x128xf32> to vector<8xf32>
    %87 = vector.shape_cast %86 : vector<8xf32> to vector<8x1xf32>
    %88 = arith.addf %44, %87 : vector<8x1xf32>
    %c0_51 = arith.constant 0 : index
    %c0_52 = arith.constant 0 : index
    %c6 = arith.constant 6 : index
    %89 = vector.load %arg2[%c0_51, %c0_52, %c6] : memref<1x8x70xf32, #tpu.memory_space<vmem>>, vector<1x8x1xf32>
    %90 = vector.shape_cast %89 : vector<1x8x1xf32> to vector<8x1xf32>
    %c0_53 = arith.constant 0 : index
    %c0_54 = arith.constant 0 : index
    %c20 = arith.constant 20 : index
    %91 = vector.load %arg2[%c0_53, %c0_54, %c20] : memref<1x8x70xf32, #tpu.memory_space<vmem>>, vector<1x8x1xf32>
    %92 = vector.shape_cast %91 : vector<1x8x1xf32> to vector<8x1xf32>
    %c0_55 = arith.constant 0 : index
    %c0_56 = arith.constant 0 : index
    %c34 = arith.constant 34 : index
    %93 = vector.load %arg2[%c0_55, %c0_56, %c34] : memref<1x8x70xf32, #tpu.memory_space<vmem>>, vector<1x8x1xf32>
    %94 = vector.shape_cast %93 : vector<1x8x1xf32> to vector<8x1xf32>
    %c0_57 = arith.constant 0 : index
    %c0_58 = arith.constant 0 : index
    %c48 = arith.constant 48 : index
    %95 = vector.load %arg2[%c0_57, %c0_58, %c48] : memref<1x8x70xf32, #tpu.memory_space<vmem>>, vector<1x8x1xf32>
    %96 = vector.shape_cast %95 : vector<1x8x1xf32> to vector<8x1xf32>
    %c0_59 = arith.constant 0 : index
    %c0_60 = arith.constant 0 : index
    %c62 = arith.constant 62 : index
    %97 = vector.load %arg2[%c0_59, %c0_60, %c62] : memref<1x8x70xf32, #tpu.memory_space<vmem>>, vector<1x8x1xf32>
    %98 = vector.shape_cast %97 : vector<1x8x1xf32> to vector<8x1xf32>
    %c0_61 = arith.constant 0 : index
    %c0_62 = arith.constant 0 : index
    %c0_63 = arith.constant 0 : index
    %99 = vector.load %arg3[%c0_61, %c0_62, %c0_63] : memref<1x8x640xf32, #tpu.memory_space<vmem>>, vector<1x8x128xf32>
    %100 = vector.shape_cast %99 : vector<1x8x128xf32> to vector<8x128xf32>
    %c0_64 = arith.constant 0 : index
    %c0_65 = arith.constant 0 : index
    %c128_66 = arith.constant 128 : index
    %101 = vector.load %arg3[%c0_64, %c0_65, %c128_66] : memref<1x8x640xf32, #tpu.memory_space<vmem>>, vector<1x8x128xf32>
    %102 = vector.shape_cast %101 : vector<1x8x128xf32> to vector<8x128xf32>
    %c0_67 = arith.constant 0 : index
    %c0_68 = arith.constant 0 : index
    %c256_69 = arith.constant 256 : index
    %103 = vector.load %arg3[%c0_67, %c0_68, %c256_69] : memref<1x8x640xf32, #tpu.memory_space<vmem>>, vector<1x8x128xf32>
    %104 = vector.shape_cast %103 : vector<1x8x128xf32> to vector<8x128xf32>
    %c0_70 = arith.constant 0 : index
    %c0_71 = arith.constant 0 : index
    %c384_72 = arith.constant 384 : index
    %105 = vector.load %arg3[%c0_70, %c0_71, %c384_72] : memref<1x8x640xf32, #tpu.memory_space<vmem>>, vector<1x8x128xf32>
    %106 = vector.shape_cast %105 : vector<1x8x128xf32> to vector<8x128xf32>
    %c0_73 = arith.constant 0 : index
    %c0_74 = arith.constant 0 : index
    %c512_75 = arith.constant 512 : index
    %107 = vector.load %arg3[%c0_73, %c0_74, %c512_75] : memref<1x8x640xf32, #tpu.memory_space<vmem>>, vector<1x8x128xf32>
    %108 = vector.shape_cast %107 : vector<1x8x128xf32> to vector<8x128xf32>
    %109 = vector.broadcast %90 : vector<8x1xf32> to vector<8x128xf32>
    %110 = arith.subf %109, %100 : vector<8x128xf32>
    %111 = vector.broadcast %92 : vector<8x1xf32> to vector<8x128xf32>
    %112 = arith.subf %111, %102 : vector<8x128xf32>
    %113 = vector.broadcast %94 : vector<8x1xf32> to vector<8x128xf32>
    %114 = arith.subf %113, %104 : vector<8x128xf32>
    %115 = arith.mulf %110, %110 : vector<8x128xf32>
    %116 = arith.mulf %112, %112 : vector<8x128xf32>
    %117 = arith.addf %115, %116 : vector<8x128xf32>
    %118 = arith.mulf %114, %114 : vector<8x128xf32>
    %119 = arith.addf %117, %118 : vector<8x128xf32>
    %120 = vector.broadcast %98 : vector<8x1xf32> to vector<8x128xf32>
    %121 = arith.addf %120, %108 : vector<8x128xf32>
    %122 = vector.broadcast %96 : vector<8x1xf32> to vector<8x128xf32>
    %123 = arith.mulf %122, %106 : vector<8x128xf32>
    %cst_76 = arith.constant 1.000000e-03 : f32
    %124 = vector.broadcast %cst_76 : f32 to vector<8x128xf32>
    %125 = arith.addf %119, %124 : vector<8x128xf32>
    %126 = arith.mulf %121, %121 : vector<8x128xf32>
    %127 = arith.cmpf olt, %125, %126 : vector<8x128xf32>
    %cst_77 = arith.constant 0.000000e+00 : f32
    %128 = vector.broadcast %cst_77 : f32 to vector<8x128xf32>
    %129 = arith.select %127, %123, %128 : vector<8x128xi1>, vector<8x128xf32>
    %cst_78 = arith.constant dense<0.000000e+00> : vector<8xf32>
    %130 = vector.multi_reduction <add>, %129, %cst_78 [1] : vector<8x128xf32> to vector<8xf32>
    %131 = vector.shape_cast %130 : vector<8xf32> to vector<8x1xf32>
    %132 = arith.addf %88, %131 : vector<8x1xf32>
    %c0_79 = arith.constant 0 : index
    %c0_80 = arith.constant 0 : index
    %c7 = arith.constant 7 : index
    %133 = vector.load %arg2[%c0_79, %c0_80, %c7] : memref<1x8x70xf32, #tpu.memory_space<vmem>>, vector<1x8x1xf32>
    %134 = vector.shape_cast %133 : vector<1x8x1xf32> to vector<8x1xf32>
    %c0_81 = arith.constant 0 : index
    %c0_82 = arith.constant 0 : index
    %c21 = arith.constant 21 : index
    %135 = vector.load %arg2[%c0_81, %c0_82, %c21] : memref<1x8x70xf32, #tpu.memory_space<vmem>>, vector<1x8x1xf32>
    %136 = vector.shape_cast %135 : vector<1x8x1xf32> to vector<8x1xf32>
    %c0_83 = arith.constant 0 : index
    %c0_84 = arith.constant 0 : index
    %c35 = arith.constant 35 : index
    %137 = vector.load %arg2[%c0_83, %c0_84, %c35] : memref<1x8x70xf32, #tpu.memory_space<vmem>>, vector<1x8x1xf32>
    %138 = vector.shape_cast %137 : vector<1x8x1xf32> to vector<8x1xf32>
    %c0_85 = arith.constant 0 : index
    %c0_86 = arith.constant 0 : index
    %c49 = arith.constant 49 : index
    %139 = vector.load %arg2[%c0_85, %c0_86, %c49] : memref<1x8x70xf32, #tpu.memory_space<vmem>>, vector<1x8x1xf32>
    %140 = vector.shape_cast %139 : vector<1x8x1xf32> to vector<8x1xf32>
    %c0_87 = arith.constant 0 : index
    %c0_88 = arith.constant 0 : index
    %c63 = arith.constant 63 : index
    %141 = vector.load %arg2[%c0_87, %c0_88, %c63] : memref<1x8x70xf32, #tpu.memory_space<vmem>>, vector<1x8x1xf32>
    %142 = vector.shape_cast %141 : vector<1x8x1xf32> to vector<8x1xf32>
    %c0_89 = arith.constant 0 : index
    %c0_90 = arith.constant 0 : index
    %c0_91 = arith.constant 0 : index
    %143 = vector.load %arg3[%c0_89, %c0_90, %c0_91] : memref<1x8x640xf32, #tpu.memory_space<vmem>>, vector<1x8x128xf32>
    %144 = vector.shape_cast %143 : vector<1x8x128xf32> to vector<8x128xf32>
    %c0_92 = arith.constant 0 : index
    %c0_93 = arith.constant 0 : index
    %c128_94 = arith.constant 128 : index
    %145 = vector.load %arg3[%c0_92, %c0_93, %c128_94] : memref<1x8x640xf32, #tpu.memory_space<vmem>>, vector<1x8x128xf32>
    %146 = vector.shape_cast %145 : vector<1x8x128xf32> to vector<8x128xf32>
    %c0_95 = arith.constant 0 : index
    %c0_96 = arith.constant 0 : index
    %c256_97 = arith.constant 256 : index
    %147 = vector.load %arg3[%c0_95, %c0_96, %c256_97] : memref<1x8x640xf32, #tpu.memory_space<vmem>>, vector<1x8x128xf32>
    %148 = vector.shape_cast %147 : vector<1x8x128xf32> to vector<8x128xf32>
    %c0_98 = arith.constant 0 : index
    %c0_99 = arith.constant 0 : index
    %c384_100 = arith.constant 384 : index
    %149 = vector.load %arg3[%c0_98, %c0_99, %c384_100] : memref<1x8x640xf32, #tpu.memory_space<vmem>>, vector<1x8x128xf32>
    %150 = vector.shape_cast %149 : vector<1x8x128xf32> to vector<8x128xf32>
    %c0_101 = arith.constant 0 : index
    %c0_102 = arith.constant 0 : index
    %c512_103 = arith.constant 512 : index
    %151 = vector.load %arg3[%c0_101, %c0_102, %c512_103] : memref<1x8x640xf32, #tpu.memory_space<vmem>>, vector<1x8x128xf32>
    %152 = vector.shape_cast %151 : vector<1x8x128xf32> to vector<8x128xf32>
    %153 = vector.broadcast %134 : vector<8x1xf32> to vector<8x128xf32>
    %154 = arith.subf %153, %144 : vector<8x128xf32>
    %155 = vector.broadcast %136 : vector<8x1xf32> to vector<8x128xf32>
    %156 = arith.subf %155, %146 : vector<8x128xf32>
    %157 = vector.broadcast %138 : vector<8x1xf32> to vector<8x128xf32>
    %158 = arith.subf %157, %148 : vector<8x128xf32>
    %159 = arith.mulf %154, %154 : vector<8x128xf32>
    %160 = arith.mulf %156, %156 : vector<8x128xf32>
    %161 = arith.addf %159, %160 : vector<8x128xf32>
    %162 = arith.mulf %158, %158 : vector<8x128xf32>
    %163 = arith.addf %161, %162 : vector<8x128xf32>
    %164 = vector.broadcast %142 : vector<8x1xf32> to vector<8x128xf32>
    %165 = arith.addf %164, %152 : vector<8x128xf32>
    %166 = vector.broadcast %140 : vector<8x1xf32> to vector<8x128xf32>
    %167 = arith.mulf %166, %150 : vector<8x128xf32>
    %cst_104 = arith.constant 1.000000e-03 : f32
    %168 = vector.broadcast %cst_104 : f32 to vector<8x128xf32>
    %169 = arith.addf %163, %168 : vector<8x128xf32>
    %170 = arith.mulf %165, %165 : vector<8x128xf32>
    %171 = arith.cmpf olt, %169, %170 : vector<8x128xf32>
    %cst_105 = arith.constant 0.000000e+00 : f32
    %172 = vector.broadcast %cst_105 : f32 to vector<8x128xf32>
    %173 = arith.select %171, %167, %172 : vector<8x128xi1>, vector<8x128xf32>
    %cst_106 = arith.constant dense<0.000000e+00> : vector<8xf32>
    %174 = vector.multi_reduction <add>, %173, %cst_106 [1] : vector<8x128xf32> to vector<8xf32>
    %175 = vector.shape_cast %174 : vector<8xf32> to vector<8x1xf32>
    %176 = arith.addf %132, %175 : vector<8x1xf32>
    %c0_107 = arith.constant 0 : index
    %c0_108 = arith.constant 0 : index
    %c8 = arith.constant 8 : index
    %177 = vector.load %arg2[%c0_107, %c0_108, %c8] : memref<1x8x70xf32, #tpu.memory_space<vmem>>, vector<1x8x1xf32>
    %178 = vector.shape_cast %177 : vector<1x8x1xf32> to vector<8x1xf32>
    %c0_109 = arith.constant 0 : index
    %c0_110 = arith.constant 0 : index
    %c22 = arith.constant 22 : index
    %179 = vector.load %arg2[%c0_109, %c0_110, %c22] : memref<1x8x70xf32, #tpu.memory_space<vmem>>, vector<1x8x1xf32>
    %180 = vector.shape_cast %179 : vector<1x8x1xf32> to vector<8x1xf32>
    %c0_111 = arith.constant 0 : index
    %c0_112 = arith.constant 0 : index
    %c36 = arith.constant 36 : index
    %181 = vector.load %arg2[%c0_111, %c0_112, %c36] : memref<1x8x70xf32, #tpu.memory_space<vmem>>, vector<1x8x1xf32>
    %182 = vector.shape_cast %181 : vector<1x8x1xf32> to vector<8x1xf32>
    %c0_113 = arith.constant 0 : index
    %c0_114 = arith.constant 0 : index
    %c50 = arith.constant 50 : index
    %183 = vector.load %arg2[%c0_113, %c0_114, %c50] : memref<1x8x70xf32, #tpu.memory_space<vmem>>, vector<1x8x1xf32>
    %184 = vector.shape_cast %183 : vector<1x8x1xf32> to vector<8x1xf32>
    %c0_115 = arith.constant 0 : index
    %c0_116 = arith.constant 0 : index
    %c64 = arith.constant 64 : index
    %185 = vector.load %arg2[%c0_115, %c0_116, %c64] : memref<1x8x70xf32, #tpu.memory_space<vmem>>, vector<1x8x1xf32>
    %186 = vector.shape_cast %185 : vector<1x8x1xf32> to vector<8x1xf32>
    %c0_117 = arith.constant 0 : index
    %c0_118 = arith.constant 0 : index
    %c0_119 = arith.constant 0 : index
    %187 = vector.load %arg3[%c0_117, %c0_118, %c0_119] : memref<1x8x640xf32, #tpu.memory_space<vmem>>, vector<1x8x128xf32>
    %188 = vector.shape_cast %187 : vector<1x8x128xf32> to vector<8x128xf32>
    %c0_120 = arith.constant 0 : index
    %c0_121 = arith.constant 0 : index
    %c128_122 = arith.constant 128 : index
    %189 = vector.load %arg3[%c0_120, %c0_121, %c128_122] : memref<1x8x640xf32, #tpu.memory_space<vmem>>, vector<1x8x128xf32>
    %190 = vector.shape_cast %189 : vector<1x8x128xf32> to vector<8x128xf32>
    %c0_123 = arith.constant 0 : index
    %c0_124 = arith.constant 0 : index
    %c256_125 = arith.constant 256 : index
    %191 = vector.load %arg3[%c0_123, %c0_124, %c256_125] : memref<1x8x640xf32, #tpu.memory_space<vmem>>, vector<1x8x128xf32>
    %192 = vector.shape_cast %191 : vector<1x8x128xf32> to vector<8x128xf32>
    %c0_126 = arith.constant 0 : index
    %c0_127 = arith.constant 0 : index
    %c384_128 = arith.constant 384 : index
    %193 = vector.load %arg3[%c0_126, %c0_127, %c384_128] : memref<1x8x640xf32, #tpu.memory_space<vmem>>, vector<1x8x128xf32>
    %194 = vector.shape_cast %193 : vector<1x8x128xf32> to vector<8x128xf32>
    %c0_129 = arith.constant 0 : index
    %c0_130 = arith.constant 0 : index
    %c512_131 = arith.constant 512 : index
    %195 = vector.load %arg3[%c0_129, %c0_130, %c512_131] : memref<1x8x640xf32, #tpu.memory_space<vmem>>, vector<1x8x128xf32>
    %196 = vector.shape_cast %195 : vector<1x8x128xf32> to vector<8x128xf32>
    %197 = vector.broadcast %178 : vector<8x1xf32> to vector<8x128xf32>
    %198 = arith.subf %197, %188 : vector<8x128xf32>
    %199 = vector.broadcast %180 : vector<8x1xf32> to vector<8x128xf32>
    %200 = arith.subf %199, %190 : vector<8x128xf32>
    %201 = vector.broadcast %182 : vector<8x1xf32> to vector<8x128xf32>
    %202 = arith.subf %201, %192 : vector<8x128xf32>
    %203 = arith.mulf %198, %198 : vector<8x128xf32>
    %204 = arith.mulf %200, %200 : vector<8x128xf32>
    %205 = arith.addf %203, %204 : vector<8x128xf32>
    %206 = arith.mulf %202, %202 : vector<8x128xf32>
    %207 = arith.addf %205, %206 : vector<8x128xf32>
    %208 = vector.broadcast %186 : vector<8x1xf32> to vector<8x128xf32>
    %209 = arith.addf %208, %196 : vector<8x128xf32>
    %210 = vector.broadcast %184 : vector<8x1xf32> to vector<8x128xf32>
    %211 = arith.mulf %210, %194 : vector<8x128xf32>
    %cst_132 = arith.constant 1.000000e-03 : f32
    %212 = vector.broadcast %cst_132 : f32 to vector<8x128xf32>
    %213 = arith.addf %207, %212 : vector<8x128xf32>
    %214 = arith.mulf %209, %209 : vector<8x128xf32>
    %215 = arith.cmpf olt, %213, %214 : vector<8x128xf32>
    %cst_133 = arith.constant 0.000000e+00 : f32
    %216 = vector.broadcast %cst_133 : f32 to vector<8x128xf32>
    %217 = arith.select %215, %211, %216 : vector<8x128xi1>, vector<8x128xf32>
    %cst_134 = arith.constant dense<0.000000e+00> : vector<8xf32>
    %218 = vector.multi_reduction <add>, %217, %cst_134 [1] : vector<8x128xf32> to vector<8xf32>
    %219 = vector.shape_cast %218 : vector<8xf32> to vector<8x1xf32>
    %220 = arith.addf %176, %219 : vector<8x1xf32>
    %c0_135 = arith.constant 0 : index
    %c0_136 = arith.constant 0 : index
    %c9 = arith.constant 9 : index
    %221 = vector.load %arg2[%c0_135, %c0_136, %c9] : memref<1x8x70xf32, #tpu.memory_space<vmem>>, vector<1x8x1xf32>
    %222 = vector.shape_cast %221 : vector<1x8x1xf32> to vector<8x1xf32>
    %c0_137 = arith.constant 0 : index
    %c0_138 = arith.constant 0 : index
    %c23 = arith.constant 23 : index
    %223 = vector.load %arg2[%c0_137, %c0_138, %c23] : memref<1x8x70xf32, #tpu.memory_space<vmem>>, vector<1x8x1xf32>
    %224 = vector.shape_cast %223 : vector<1x8x1xf32> to vector<8x1xf32>
    %c0_139 = arith.constant 0 : index
    %c0_140 = arith.constant 0 : index
    %c37 = arith.constant 37 : index
    %225 = vector.load %arg2[%c0_139, %c0_140, %c37] : memref<1x8x70xf32, #tpu.memory_space<vmem>>, vector<1x8x1xf32>
    %226 = vector.shape_cast %225 : vector<1x8x1xf32> to vector<8x1xf32>
    %c0_141 = arith.constant 0 : index
    %c0_142 = arith.constant 0 : index
    %c51 = arith.constant 51 : index
    %227 = vector.load %arg2[%c0_141, %c0_142, %c51] : memref<1x8x70xf32, #tpu.memory_space<vmem>>, vector<1x8x1xf32>
    %228 = vector.shape_cast %227 : vector<1x8x1xf32> to vector<8x1xf32>
    %c0_143 = arith.constant 0 : index
    %c0_144 = arith.constant 0 : index
    %c65 = arith.constant 65 : index
    %229 = vector.load %arg2[%c0_143, %c0_144, %c65] : memref<1x8x70xf32, #tpu.memory_space<vmem>>, vector<1x8x1xf32>
    %230 = vector.shape_cast %229 : vector<1x8x1xf32> to vector<8x1xf32>
    %c0_145 = arith.constant 0 : index
    %c0_146 = arith.constant 0 : index
    %c0_147 = arith.constant 0 : index
    %231 = vector.load %arg3[%c0_145, %c0_146, %c0_147] : memref<1x8x640xf32, #tpu.memory_space<vmem>>, vector<1x8x128xf32>
    %232 = vector.shape_cast %231 : vector<1x8x128xf32> to vector<8x128xf32>
    %c0_148 = arith.constant 0 : index
    %c0_149 = arith.constant 0 : index
    %c128_150 = arith.constant 128 : index
    %233 = vector.load %arg3[%c0_148, %c0_149, %c128_150] : memref<1x8x640xf32, #tpu.memory_space<vmem>>, vector<1x8x128xf32>
    %234 = vector.shape_cast %233 : vector<1x8x128xf32> to vector<8x128xf32>
    %c0_151 = arith.constant 0 : index
    %c0_152 = arith.constant 0 : index
    %c256_153 = arith.constant 256 : index
    %235 = vector.load %arg3[%c0_151, %c0_152, %c256_153] : memref<1x8x640xf32, #tpu.memory_space<vmem>>, vector<1x8x128xf32>
    %236 = vector.shape_cast %235 : vector<1x8x128xf32> to vector<8x128xf32>
    %c0_154 = arith.constant 0 : index
    %c0_155 = arith.constant 0 : index
    %c384_156 = arith.constant 384 : index
    %237 = vector.load %arg3[%c0_154, %c0_155, %c384_156] : memref<1x8x640xf32, #tpu.memory_space<vmem>>, vector<1x8x128xf32>
    %238 = vector.shape_cast %237 : vector<1x8x128xf32> to vector<8x128xf32>
    %c0_157 = arith.constant 0 : index
    %c0_158 = arith.constant 0 : index
    %c512_159 = arith.constant 512 : index
    %239 = vector.load %arg3[%c0_157, %c0_158, %c512_159] : memref<1x8x640xf32, #tpu.memory_space<vmem>>, vector<1x8x128xf32>
    %240 = vector.shape_cast %239 : vector<1x8x128xf32> to vector<8x128xf32>
    %241 = vector.broadcast %222 : vector<8x1xf32> to vector<8x128xf32>
    %242 = arith.subf %241, %232 : vector<8x128xf32>
    %243 = vector.broadcast %224 : vector<8x1xf32> to vector<8x128xf32>
    %244 = arith.subf %243, %234 : vector<8x128xf32>
    %245 = vector.broadcast %226 : vector<8x1xf32> to vector<8x128xf32>
    %246 = arith.subf %245, %236 : vector<8x128xf32>
    %247 = arith.mulf %242, %242 : vector<8x128xf32>
    %248 = arith.mulf %244, %244 : vector<8x128xf32>
    %249 = arith.addf %247, %248 : vector<8x128xf32>
    %250 = arith.mulf %246, %246 : vector<8x128xf32>
    %251 = arith.addf %249, %250 : vector<8x128xf32>
    %252 = vector.broadcast %230 : vector<8x1xf32> to vector<8x128xf32>
    %253 = arith.addf %252, %240 : vector<8x128xf32>
    %254 = vector.broadcast %228 : vector<8x1xf32> to vector<8x128xf32>
    %255 = arith.mulf %254, %238 : vector<8x128xf32>
    %cst_160 = arith.constant 1.000000e-03 : f32
    %256 = vector.broadcast %cst_160 : f32 to vector<8x128xf32>
    %257 = arith.addf %251, %256 : vector<8x128xf32>
    %258 = arith.mulf %253, %253 : vector<8x128xf32>
    %259 = arith.cmpf olt, %257, %258 : vector<8x128xf32>
    %cst_161 = arith.constant 0.000000e+00 : f32
    %260 = vector.broadcast %cst_161 : f32 to vector<8x128xf32>
    %261 = arith.select %259, %255, %260 : vector<8x128xi1>, vector<8x128xf32>
    %cst_162 = arith.constant dense<0.000000e+00> : vector<8xf32>
    %262 = vector.multi_reduction <add>, %261, %cst_162 [1] : vector<8x128xf32> to vector<8xf32>
    %263 = vector.shape_cast %262 : vector<8xf32> to vector<8x1xf32>
    %264 = arith.addf %220, %263 : vector<8x1xf32>
    %c0_163 = arith.constant 0 : index
    %c0_164 = arith.constant 0 : index
    %c10 = arith.constant 10 : index
    %265 = vector.load %arg2[%c0_163, %c0_164, %c10] : memref<1x8x70xf32, #tpu.memory_space<vmem>>, vector<1x8x1xf32>
    %266 = vector.shape_cast %265 : vector<1x8x1xf32> to vector<8x1xf32>
    %c0_165 = arith.constant 0 : index
    %c0_166 = arith.constant 0 : index
    %c24 = arith.constant 24 : index
    %267 = vector.load %arg2[%c0_165, %c0_166, %c24] : memref<1x8x70xf32, #tpu.memory_space<vmem>>, vector<1x8x1xf32>
    %268 = vector.shape_cast %267 : vector<1x8x1xf32> to vector<8x1xf32>
    %c0_167 = arith.constant 0 : index
    %c0_168 = arith.constant 0 : index
    %c38 = arith.constant 38 : index
    %269 = vector.load %arg2[%c0_167, %c0_168, %c38] : memref<1x8x70xf32, #tpu.memory_space<vmem>>, vector<1x8x1xf32>
    %270 = vector.shape_cast %269 : vector<1x8x1xf32> to vector<8x1xf32>
    %c0_169 = arith.constant 0 : index
    %c0_170 = arith.constant 0 : index
    %c52 = arith.constant 52 : index
    %271 = vector.load %arg2[%c0_169, %c0_170, %c52] : memref<1x8x70xf32, #tpu.memory_space<vmem>>, vector<1x8x1xf32>
    %272 = vector.shape_cast %271 : vector<1x8x1xf32> to vector<8x1xf32>
    %c0_171 = arith.constant 0 : index
    %c0_172 = arith.constant 0 : index
    %c66 = arith.constant 66 : index
    %273 = vector.load %arg2[%c0_171, %c0_172, %c66] : memref<1x8x70xf32, #tpu.memory_space<vmem>>, vector<1x8x1xf32>
    %274 = vector.shape_cast %273 : vector<1x8x1xf32> to vector<8x1xf32>
    %c0_173 = arith.constant 0 : index
    %c0_174 = arith.constant 0 : index
    %c0_175 = arith.constant 0 : index
    %275 = vector.load %arg3[%c0_173, %c0_174, %c0_175] : memref<1x8x640xf32, #tpu.memory_space<vmem>>, vector<1x8x128xf32>
    %276 = vector.shape_cast %275 : vector<1x8x128xf32> to vector<8x128xf32>
    %c0_176 = arith.constant 0 : index
    %c0_177 = arith.constant 0 : index
    %c128_178 = arith.constant 128 : index
    %277 = vector.load %arg3[%c0_176, %c0_177, %c128_178] : memref<1x8x640xf32, #tpu.memory_space<vmem>>, vector<1x8x128xf32>
    %278 = vector.shape_cast %277 : vector<1x8x128xf32> to vector<8x128xf32>
    %c0_179 = arith.constant 0 : index
    %c0_180 = arith.constant 0 : index
    %c256_181 = arith.constant 256 : index
    %279 = vector.load %arg3[%c0_179, %c0_180, %c256_181] : memref<1x8x640xf32, #tpu.memory_space<vmem>>, vector<1x8x128xf32>
    %280 = vector.shape_cast %279 : vector<1x8x128xf32> to vector<8x128xf32>
    %c0_182 = arith.constant 0 : index
    %c0_183 = arith.constant 0 : index
    %c384_184 = arith.constant 384 : index
    %281 = vector.load %arg3[%c0_182, %c0_183, %c384_184] : memref<1x8x640xf32, #tpu.memory_space<vmem>>, vector<1x8x128xf32>
    %282 = vector.shape_cast %281 : vector<1x8x128xf32> to vector<8x128xf32>
    %c0_185 = arith.constant 0 : index
    %c0_186 = arith.constant 0 : index
    %c512_187 = arith.constant 512 : index
    %283 = vector.load %arg3[%c0_185, %c0_186, %c512_187] : memref<1x8x640xf32, #tpu.memory_space<vmem>>, vector<1x8x128xf32>
    %284 = vector.shape_cast %283 : vector<1x8x128xf32> to vector<8x128xf32>
    %285 = vector.broadcast %266 : vector<8x1xf32> to vector<8x128xf32>
    %286 = arith.subf %285, %276 : vector<8x128xf32>
    %287 = vector.broadcast %268 : vector<8x1xf32> to vector<8x128xf32>
    %288 = arith.subf %287, %278 : vector<8x128xf32>
    %289 = vector.broadcast %270 : vector<8x1xf32> to vector<8x128xf32>
    %290 = arith.subf %289, %280 : vector<8x128xf32>
    %291 = arith.mulf %286, %286 : vector<8x128xf32>
    %292 = arith.mulf %288, %288 : vector<8x128xf32>
    %293 = arith.addf %291, %292 : vector<8x128xf32>
    %294 = arith.mulf %290, %290 : vector<8x128xf32>
    %295 = arith.addf %293, %294 : vector<8x128xf32>
    %296 = vector.broadcast %274 : vector<8x1xf32> to vector<8x128xf32>
    %297 = arith.addf %296, %284 : vector<8x128xf32>
    %298 = vector.broadcast %272 : vector<8x1xf32> to vector<8x128xf32>
    %299 = arith.mulf %298, %282 : vector<8x128xf32>
    %cst_188 = arith.constant 1.000000e-03 : f32
    %300 = vector.broadcast %cst_188 : f32 to vector<8x128xf32>
    %301 = arith.addf %295, %300 : vector<8x128xf32>
    %302 = arith.mulf %297, %297 : vector<8x128xf32>
    %303 = arith.cmpf olt, %301, %302 : vector<8x128xf32>
    %cst_189 = arith.constant 0.000000e+00 : f32
    %304 = vector.broadcast %cst_189 : f32 to vector<8x128xf32>
    %305 = arith.select %303, %299, %304 : vector<8x128xi1>, vector<8x128xf32>
    %cst_190 = arith.constant dense<0.000000e+00> : vector<8xf32>
    %306 = vector.multi_reduction <add>, %305, %cst_190 [1] : vector<8x128xf32> to vector<8xf32>
    %307 = vector.shape_cast %306 : vector<8xf32> to vector<8x1xf32>
    %308 = arith.addf %264, %307 : vector<8x1xf32>
    %c0_191 = arith.constant 0 : index
    %c0_192 = arith.constant 0 : index
    %c11 = arith.constant 11 : index
    %309 = vector.load %arg2[%c0_191, %c0_192, %c11] : memref<1x8x70xf32, #tpu.memory_space<vmem>>, vector<1x8x1xf32>
    %310 = vector.shape_cast %309 : vector<1x8x1xf32> to vector<8x1xf32>
    %c0_193 = arith.constant 0 : index
    %c0_194 = arith.constant 0 : index
    %c25 = arith.constant 25 : index
    %311 = vector.load %arg2[%c0_193, %c0_194, %c25] : memref<1x8x70xf32, #tpu.memory_space<vmem>>, vector<1x8x1xf32>
    %312 = vector.shape_cast %311 : vector<1x8x1xf32> to vector<8x1xf32>
    %c0_195 = arith.constant 0 : index
    %c0_196 = arith.constant 0 : index
    %c39 = arith.constant 39 : index
    %313 = vector.load %arg2[%c0_195, %c0_196, %c39] : memref<1x8x70xf32, #tpu.memory_space<vmem>>, vector<1x8x1xf32>
    %314 = vector.shape_cast %313 : vector<1x8x1xf32> to vector<8x1xf32>
    %c0_197 = arith.constant 0 : index
    %c0_198 = arith.constant 0 : index
    %c53 = arith.constant 53 : index
    %315 = vector.load %arg2[%c0_197, %c0_198, %c53] : memref<1x8x70xf32, #tpu.memory_space<vmem>>, vector<1x8x1xf32>
    %316 = vector.shape_cast %315 : vector<1x8x1xf32> to vector<8x1xf32>
    %c0_199 = arith.constant 0 : index
    %c0_200 = arith.constant 0 : index
    %c67 = arith.constant 67 : index
    %317 = vector.load %arg2[%c0_199, %c0_200, %c67] : memref<1x8x70xf32, #tpu.memory_space<vmem>>, vector<1x8x1xf32>
    %318 = vector.shape_cast %317 : vector<1x8x1xf32> to vector<8x1xf32>
    %c0_201 = arith.constant 0 : index
    %c0_202 = arith.constant 0 : index
    %c0_203 = arith.constant 0 : index
    %319 = vector.load %arg3[%c0_201, %c0_202, %c0_203] : memref<1x8x640xf32, #tpu.memory_space<vmem>>, vector<1x8x128xf32>
    %320 = vector.shape_cast %319 : vector<1x8x128xf32> to vector<8x128xf32>
    %c0_204 = arith.constant 0 : index
    %c0_205 = arith.constant 0 : index
    %c128_206 = arith.constant 128 : index
    %321 = vector.load %arg3[%c0_204, %c0_205, %c128_206] : memref<1x8x640xf32, #tpu.memory_space<vmem>>, vector<1x8x128xf32>
    %322 = vector.shape_cast %321 : vector<1x8x128xf32> to vector<8x128xf32>
    %c0_207 = arith.constant 0 : index
    %c0_208 = arith.constant 0 : index
    %c256_209 = arith.constant 256 : index
    %323 = vector.load %arg3[%c0_207, %c0_208, %c256_209] : memref<1x8x640xf32, #tpu.memory_space<vmem>>, vector<1x8x128xf32>
    %324 = vector.shape_cast %323 : vector<1x8x128xf32> to vector<8x128xf32>
    %c0_210 = arith.constant 0 : index
    %c0_211 = arith.constant 0 : index
    %c384_212 = arith.constant 384 : index
    %325 = vector.load %arg3[%c0_210, %c0_211, %c384_212] : memref<1x8x640xf32, #tpu.memory_space<vmem>>, vector<1x8x128xf32>
    %326 = vector.shape_cast %325 : vector<1x8x128xf32> to vector<8x128xf32>
    %c0_213 = arith.constant 0 : index
    %c0_214 = arith.constant 0 : index
    %c512_215 = arith.constant 512 : index
    %327 = vector.load %arg3[%c0_213, %c0_214, %c512_215] : memref<1x8x640xf32, #tpu.memory_space<vmem>>, vector<1x8x128xf32>
    %328 = vector.shape_cast %327 : vector<1x8x128xf32> to vector<8x128xf32>
    %329 = vector.broadcast %310 : vector<8x1xf32> to vector<8x128xf32>
    %330 = arith.subf %329, %320 : vector<8x128xf32>
    %331 = vector.broadcast %312 : vector<8x1xf32> to vector<8x128xf32>
    %332 = arith.subf %331, %322 : vector<8x128xf32>
    %333 = vector.broadcast %314 : vector<8x1xf32> to vector<8x128xf32>
    %334 = arith.subf %333, %324 : vector<8x128xf32>
    %335 = arith.mulf %330, %330 : vector<8x128xf32>
    %336 = arith.mulf %332, %332 : vector<8x128xf32>
    %337 = arith.addf %335, %336 : vector<8x128xf32>
    %338 = arith.mulf %334, %334 : vector<8x128xf32>
    %339 = arith.addf %337, %338 : vector<8x128xf32>
    %340 = vector.broadcast %318 : vector<8x1xf32> to vector<8x128xf32>
    %341 = arith.addf %340, %328 : vector<8x128xf32>
    %342 = vector.broadcast %316 : vector<8x1xf32> to vector<8x128xf32>
    %343 = arith.mulf %342, %326 : vector<8x128xf32>
    %cst_216 = arith.constant 1.000000e-03 : f32
    %344 = vector.broadcast %cst_216 : f32 to vector<8x128xf32>
    %345 = arith.addf %339, %344 : vector<8x128xf32>
    %346 = arith.mulf %341, %341 : vector<8x128xf32>
    %347 = arith.cmpf olt, %345, %346 : vector<8x128xf32>
    %cst_217 = arith.constant 0.000000e+00 : f32
    %348 = vector.broadcast %cst_217 : f32 to vector<8x128xf32>
    %349 = arith.select %347, %343, %348 : vector<8x128xi1>, vector<8x128xf32>
    %cst_218 = arith.constant dense<0.000000e+00> : vector<8xf32>
    %350 = vector.multi_reduction <add>, %349, %cst_218 [1] : vector<8x128xf32> to vector<8xf32>
    %351 = vector.shape_cast %350 : vector<8xf32> to vector<8x1xf32>
    %352 = arith.addf %308, %351 : vector<8x1xf32>
    %c0_219 = arith.constant 0 : index
    %c0_220 = arith.constant 0 : index
    %c12 = arith.constant 12 : index
    %353 = vector.load %arg2[%c0_219, %c0_220, %c12] : memref<1x8x70xf32, #tpu.memory_space<vmem>>, vector<1x8x1xf32>
    %354 = vector.shape_cast %353 : vector<1x8x1xf32> to vector<8x1xf32>
    %c0_221 = arith.constant 0 : index
    %c0_222 = arith.constant 0 : index
    %c26 = arith.constant 26 : index
    %355 = vector.load %arg2[%c0_221, %c0_222, %c26] : memref<1x8x70xf32, #tpu.memory_space<vmem>>, vector<1x8x1xf32>
    %356 = vector.shape_cast %355 : vector<1x8x1xf32> to vector<8x1xf32>
    %c0_223 = arith.constant 0 : index
    %c0_224 = arith.constant 0 : index
    %c40 = arith.constant 40 : index
    %357 = vector.load %arg2[%c0_223, %c0_224, %c40] : memref<1x8x70xf32, #tpu.memory_space<vmem>>, vector<1x8x1xf32>
    %358 = vector.shape_cast %357 : vector<1x8x1xf32> to vector<8x1xf32>
    %c0_225 = arith.constant 0 : index
    %c0_226 = arith.constant 0 : index
    %c54 = arith.constant 54 : index
    %359 = vector.load %arg2[%c0_225, %c0_226, %c54] : memref<1x8x70xf32, #tpu.memory_space<vmem>>, vector<1x8x1xf32>
    %360 = vector.shape_cast %359 : vector<1x8x1xf32> to vector<8x1xf32>
    %c0_227 = arith.constant 0 : index
    %c0_228 = arith.constant 0 : index
    %c68 = arith.constant 68 : index
    %361 = vector.load %arg2[%c0_227, %c0_228, %c68] : memref<1x8x70xf32, #tpu.memory_space<vmem>>, vector<1x8x1xf32>
    %362 = vector.shape_cast %361 : vector<1x8x1xf32> to vector<8x1xf32>
    %c0_229 = arith.constant 0 : index
    %c0_230 = arith.constant 0 : index
    %c0_231 = arith.constant 0 : index
    %363 = vector.load %arg3[%c0_229, %c0_230, %c0_231] : memref<1x8x640xf32, #tpu.memory_space<vmem>>, vector<1x8x128xf32>
    %364 = vector.shape_cast %363 : vector<1x8x128xf32> to vector<8x128xf32>
    %c0_232 = arith.constant 0 : index
    %c0_233 = arith.constant 0 : index
    %c128_234 = arith.constant 128 : index
    %365 = vector.load %arg3[%c0_232, %c0_233, %c128_234] : memref<1x8x640xf32, #tpu.memory_space<vmem>>, vector<1x8x128xf32>
    %366 = vector.shape_cast %365 : vector<1x8x128xf32> to vector<8x128xf32>
    %c0_235 = arith.constant 0 : index
    %c0_236 = arith.constant 0 : index
    %c256_237 = arith.constant 256 : index
    %367 = vector.load %arg3[%c0_235, %c0_236, %c256_237] : memref<1x8x640xf32, #tpu.memory_space<vmem>>, vector<1x8x128xf32>
    %368 = vector.shape_cast %367 : vector<1x8x128xf32> to vector<8x128xf32>
    %c0_238 = arith.constant 0 : index
    %c0_239 = arith.constant 0 : index
    %c384_240 = arith.constant 384 : index
    %369 = vector.load %arg3[%c0_238, %c0_239, %c384_240] : memref<1x8x640xf32, #tpu.memory_space<vmem>>, vector<1x8x128xf32>
    %370 = vector.shape_cast %369 : vector<1x8x128xf32> to vector<8x128xf32>
    %c0_241 = arith.constant 0 : index
    %c0_242 = arith.constant 0 : index
    %c512_243 = arith.constant 512 : index
    %371 = vector.load %arg3[%c0_241, %c0_242, %c512_243] : memref<1x8x640xf32, #tpu.memory_space<vmem>>, vector<1x8x128xf32>
    %372 = vector.shape_cast %371 : vector<1x8x128xf32> to vector<8x128xf32>
    %373 = vector.broadcast %354 : vector<8x1xf32> to vector<8x128xf32>
    %374 = arith.subf %373, %364 : vector<8x128xf32>
    %375 = vector.broadcast %356 : vector<8x1xf32> to vector<8x128xf32>
    %376 = arith.subf %375, %366 : vector<8x128xf32>
    %377 = vector.broadcast %358 : vector<8x1xf32> to vector<8x128xf32>
    %378 = arith.subf %377, %368 : vector<8x128xf32>
    %379 = arith.mulf %374, %374 : vector<8x128xf32>
    %380 = arith.mulf %376, %376 : vector<8x128xf32>
    %381 = arith.addf %379, %380 : vector<8x128xf32>
    %382 = arith.mulf %378, %378 : vector<8x128xf32>
    %383 = arith.addf %381, %382 : vector<8x128xf32>
    %384 = vector.broadcast %362 : vector<8x1xf32> to vector<8x128xf32>
    %385 = arith.addf %384, %372 : vector<8x128xf32>
    %386 = vector.broadcast %360 : vector<8x1xf32> to vector<8x128xf32>
    %387 = arith.mulf %386, %370 : vector<8x128xf32>
    %cst_244 = arith.constant 1.000000e-03 : f32
    %388 = vector.broadcast %cst_244 : f32 to vector<8x128xf32>
    %389 = arith.addf %383, %388 : vector<8x128xf32>
    %390 = arith.mulf %385, %385 : vector<8x128xf32>
    %391 = arith.cmpf olt, %389, %390 : vector<8x128xf32>
    %cst_245 = arith.constant 0.000000e+00 : f32
    %392 = vector.broadcast %cst_245 : f32 to vector<8x128xf32>
    %393 = arith.select %391, %387, %392 : vector<8x128xi1>, vector<8x128xf32>
    %cst_246 = arith.constant dense<0.000000e+00> : vector<8xf32>
    %394 = vector.multi_reduction <add>, %393, %cst_246 [1] : vector<8x128xf32> to vector<8xf32>
    %395 = vector.shape_cast %394 : vector<8xf32> to vector<8x1xf32>
    %396 = arith.addf %352, %395 : vector<8x1xf32>
    %c0_247 = arith.constant 0 : index
    %c0_248 = arith.constant 0 : index
    %c13 = arith.constant 13 : index
    %397 = vector.load %arg2[%c0_247, %c0_248, %c13] : memref<1x8x70xf32, #tpu.memory_space<vmem>>, vector<1x8x1xf32>
    %398 = vector.shape_cast %397 : vector<1x8x1xf32> to vector<8x1xf32>
    %c0_249 = arith.constant 0 : index
    %c0_250 = arith.constant 0 : index
    %c27 = arith.constant 27 : index
    %399 = vector.load %arg2[%c0_249, %c0_250, %c27] : memref<1x8x70xf32, #tpu.memory_space<vmem>>, vector<1x8x1xf32>
    %400 = vector.shape_cast %399 : vector<1x8x1xf32> to vector<8x1xf32>
    %c0_251 = arith.constant 0 : index
    %c0_252 = arith.constant 0 : index
    %c41 = arith.constant 41 : index
    %401 = vector.load %arg2[%c0_251, %c0_252, %c41] : memref<1x8x70xf32, #tpu.memory_space<vmem>>, vector<1x8x1xf32>
    %402 = vector.shape_cast %401 : vector<1x8x1xf32> to vector<8x1xf32>
    %c0_253 = arith.constant 0 : index
    %c0_254 = arith.constant 0 : index
    %c55 = arith.constant 55 : index
    %403 = vector.load %arg2[%c0_253, %c0_254, %c55] : memref<1x8x70xf32, #tpu.memory_space<vmem>>, vector<1x8x1xf32>
    %404 = vector.shape_cast %403 : vector<1x8x1xf32> to vector<8x1xf32>
    %c0_255 = arith.constant 0 : index
    %c0_256 = arith.constant 0 : index
    %c69 = arith.constant 69 : index
    %405 = vector.load %arg2[%c0_255, %c0_256, %c69] : memref<1x8x70xf32, #tpu.memory_space<vmem>>, vector<1x8x1xf32>
    %406 = vector.shape_cast %405 : vector<1x8x1xf32> to vector<8x1xf32>
    %c0_257 = arith.constant 0 : index
    %c0_258 = arith.constant 0 : index
    %c0_259 = arith.constant 0 : index
    %407 = vector.load %arg3[%c0_257, %c0_258, %c0_259] : memref<1x8x640xf32, #tpu.memory_space<vmem>>, vector<1x8x128xf32>
    %408 = vector.shape_cast %407 : vector<1x8x128xf32> to vector<8x128xf32>
    %c0_260 = arith.constant 0 : index
    %c0_261 = arith.constant 0 : index
    %c128_262 = arith.constant 128 : index
    %409 = vector.load %arg3[%c0_260, %c0_261, %c128_262] : memref<1x8x640xf32, #tpu.memory_space<vmem>>, vector<1x8x128xf32>
    %410 = vector.shape_cast %409 : vector<1x8x128xf32> to vector<8x128xf32>
    %c0_263 = arith.constant 0 : index
    %c0_264 = arith.constant 0 : index
    %c256_265 = arith.constant 256 : index
    %411 = vector.load %arg3[%c0_263, %c0_264, %c256_265] : memref<1x8x640xf32, #tpu.memory_space<vmem>>, vector<1x8x128xf32>
    %412 = vector.shape_cast %411 : vector<1x8x128xf32> to vector<8x128xf32>
    %c0_266 = arith.constant 0 : index
    %c0_267 = arith.constant 0 : index
    %c384_268 = arith.constant 384 : index
    %413 = vector.load %arg3[%c0_266, %c0_267, %c384_268] : memref<1x8x640xf32, #tpu.memory_space<vmem>>, vector<1x8x128xf32>
    %414 = vector.shape_cast %413 : vector<1x8x128xf32> to vector<8x128xf32>
    %c0_269 = arith.constant 0 : index
    %c0_270 = arith.constant 0 : index
    %c512_271 = arith.constant 512 : index
    %415 = vector.load %arg3[%c0_269, %c0_270, %c512_271] : memref<1x8x640xf32, #tpu.memory_space<vmem>>, vector<1x8x128xf32>
    %416 = vector.shape_cast %415 : vector<1x8x128xf32> to vector<8x128xf32>
    %417 = vector.broadcast %398 : vector<8x1xf32> to vector<8x128xf32>
    %418 = arith.subf %417, %408 : vector<8x128xf32>
    %419 = vector.broadcast %400 : vector<8x1xf32> to vector<8x128xf32>
    %420 = arith.subf %419, %410 : vector<8x128xf32>
    %421 = vector.broadcast %402 : vector<8x1xf32> to vector<8x128xf32>
    %422 = arith.subf %421, %412 : vector<8x128xf32>
    %423 = arith.mulf %418, %418 : vector<8x128xf32>
    %424 = arith.mulf %420, %420 : vector<8x128xf32>
    %425 = arith.addf %423, %424 : vector<8x128xf32>
    %426 = arith.mulf %422, %422 : vector<8x128xf32>
    %427 = arith.addf %425, %426 : vector<8x128xf32>
    %428 = vector.broadcast %406 : vector<8x1xf32> to vector<8x128xf32>
    %429 = arith.addf %428, %416 : vector<8x128xf32>
    %430 = vector.broadcast %404 : vector<8x1xf32> to vector<8x128xf32>
    %431 = arith.mulf %430, %414 : vector<8x128xf32>
    %cst_272 = arith.constant 1.000000e-03 : f32
    %432 = vector.broadcast %cst_272 : f32 to vector<8x128xf32>
    %433 = arith.addf %427, %432 : vector<8x128xf32>
    %434 = arith.mulf %429, %429 : vector<8x128xf32>
    %435 = arith.cmpf olt, %433, %434 : vector<8x128xf32>
    %cst_273 = arith.constant 0.000000e+00 : f32
    %436 = vector.broadcast %cst_273 : f32 to vector<8x128xf32>
    %437 = arith.select %435, %431, %436 : vector<8x128xi1>, vector<8x128xf32>
    %cst_274 = arith.constant dense<0.000000e+00> : vector<8xf32>
    %438 = vector.multi_reduction <add>, %437, %cst_274 [1] : vector<8x128xf32> to vector<8xf32>
    %439 = vector.shape_cast %438 : vector<8xf32> to vector<8x1xf32>
    %440 = arith.addf %396, %439 : vector<8x1xf32>
    %441 = vector.shape_cast %440 : vector<8x1xf32> to vector<8xf32>
    %c0_275 = arith.constant 0 : index
    %c0_276 = arith.constant 0 : index
    %c0_277 = arith.constant 0 : index
    %442 = vector.load %arg4[%c0_275, %c0_276, %c0_277] : memref<1x1x8xf32, #tpu.memory_space<vmem>>, vector<1x1x8xf32>
    %443 = vector.shape_cast %442 : vector<1x1x8xf32> to vector<8xf32>
    %444 = vector.shape_cast %441 : vector<8xf32> to vector<1x1x8xf32>
    tpu.vector_store %arg4[%c0_275, %c0_276, %c0_277], %444 {strides = array<i32>} : memref<1x1x8xf32, #tpu.memory_space<vmem>>, vector<1x1x8xf32>,
    return
  }
  func.func @transform_0(%arg0: i32, %arg1: i32) -> (i32, i32, i32) {
    %c0_i32 = arith.constant 0 : i32
    %c0_i32_0 = arith.constant 0 : i32
    return %arg0, %arg1, %c0_i32 : i32, i32, i32
  }
  func.func @transform_1(%arg0: i32, %arg1: i32) -> (i32, i32, i32) {
    %c0_i32 = arith.constant 0 : i32
    %c0_i32_0 = arith.constant 0 : i32
    return %arg0, %arg1, %c0_i32 : i32, i32, i32
  }
  func.func @transform_2(%arg0: i32, %arg1: i32) -> (i32, i32, i32) {
    %c0_i32 = arith.constant 0 : i32
    %c0_i32_0 = arith.constant 0 : i32
    return %arg0, %c0_i32, %arg1 : i32, i32, i32
  }
}

</mosaic_0001>

<bundles_post_ra>
// kernel: tpu_custom_call.1
= control target key start
LH: loop header
LB: loop body
LE: loop exit
PB: predicated region body
PF: predicated region fallthrough
CT: control target
= control target key end

     0   :  { %7 = vsyncpa [#allocation3], 0  ;;  %s1453_s0 = inlined_call_operand.hbm [shape: f32[2,8,70], index: 0, kind: input, shape index: {}]   ;;  %s1454_s1 = inlined_call_operand.hbm [shape: f32[2,8,640], index: 1, kind: input, shape index: {}]   ;;  %s1455_s2 = inlined_call_operand.hbm [shape: f32[2,1,8], index: 2, kind: output, shape index: {}]  }
   0x1   :  { %9 = vsyncpa [#allocation3 + $0x1], 0 }
   0x2   :  { %10 = vsyncpa [#allocation6], 0 }
   0x3   :  { %12 = vsyncpa [#allocation6 + $0x1], 0 }
   0x4   :  { %13 = vsyncpa [#allocation4], 0 }
   0x5   :  { %15 = vsyncpa [#allocation4 + $0x1], 0  ;;  %s1118_s9 = smov 0   ;;  %s1120_s10 = smov 0  }
   0x6   :  { %s1122_s11 = smov 0   ;;  %s1124_s12 = smov 0  }
   0x7   :  { %s1126_s13 = smov 0   ;;  %s1128_s14 = smov 0  }
   0x8 LB: > { %s720_s15 = sadd.s32 4294967295, %s1048_s14   ;;  %s721_s16 = sadd.s32 4294967294, %s1048_s14   ;;  %s1048_s14 = sphi %s1128_s14, %s21_s14   ;;  %s1044_s13 = sphi %s1126_s13, %s1475_s13   ;;  %s1040_s12 = sphi %s1124_s12, %s1474_s12   ;;  %s1036_s11 = sphi %s1122_s11, %s1473_s11   ;;  %s1032_s10 = sphi %s1120_s10, %s1472_s10   ;;  %s1028_s9 = sphi %s1118_s9, %s1471_s9  }
   0x9   : > { %s33_s17 = sadd.s32 1, %s1044_s13  ;;  %s42_s18 = sadd.s32 1, %s1036_s11 }
   0xa   : > { %p35_p0 = scmp.ge.s32.totalorder %s33_s17, 2  ;;  %p49_p1 = scmp.ne.s32.totalorder %s1036_s11, %s1032_s10 }
   0xb   : > { %p50_p2 = scmp.eq.s32.totalorder %s1048_s14, 0  ;;  %p55_p3 = scmp.ne.s32.totalorder %s1032_s10, %s1028_s9 }
   0xc   : > { %s1477_s17 = smov (%p35_p0, %s33_s17), 0  ;;  %p56_p5 = scmp.eq.s32.totalorder %s720_s15, 0 }
   0xd   : > { %p1159_p4 = por %p50_p2, %p49_p1  ;;  %s37_s20 = ssub.s32 %s1044_s13, %s1477_s17 }
   0xe   : > { %p109_p6 = scmp.eq.s32.totalorder %s720_s15, 1  ;;  %p40_p7 = scmp.eq.s32.totalorder %s37_s20, 0 }
   0xf   : > { %p1165_p8 = por %p56_p5, %p55_p3  ;;  %p115_p10 = scmp.eq.s32.totalorder %s721_s16, 1 }
  0x10   : > { %p1169_p9 = por %p109_p6, %p49_p1  ;;  %p752_p13 = scmp.lt.s32.totalorder %s1048_s14, 2 }
  0x11   : > { %s1459_s21 = scalar_select %p1165_p8, 1, 0 }
  0x12   : > { %s1460_s22 = scalar_select %p1169_p9, 1, 0 }
  0x13   : > { %s1174_s23 = scalar_select %p40_p7, %s1036_s11, %s42_s18  }
  0x14   : > { %p1176_p11 = por %p115_p10, %p55_p3  ;;  %s1183_s25 = sand.u32 1, %s1036_s11  }
  0x15   : > { %s724_s26 = sshll.u32 %s1183_s25, 3  ;;  %s725_s27 = sshll.u32 %s1044_s13, 7 }
  0x16   : > { %s1461_s24 = scalar_select %p1176_p11, 1, 0 }
  0x17   : > { %s1190_s30 = scalar_lea.hbm %s1453_s0, %s725_s27  ;;  %s139_s3 = scalar_lea.vmem [#allocation2], %s724_s26 }
  0x18   : > { %s147_s4 = sshll.u32 %s139_s3, 4  ;;  %p1196_p0 = pnand %p752_p13, %p1159_p4  ;;  %s1192_s4 = int_to_ptr.vmem [resolvable:$true] %s147_s4 }
  0x19   : > { %s136_s6 = scalar_lea.sflag [#allocation3], %s1183_s25  ;;  %s902_s7 = scalar_lea.hbm %s1190_s30, 128 }
  0x1a   : > { %p903_p3 = scmp.ne.s32.totalorder %s1190_s30, %s902_s7  ;;  %p904_p5 = pneg %p1196_p0 }
  0x1b   : > { %s907_s16 = scalar_lea.hbm %s1453_s0, 256  ;;  %p908_p4 = scmp.lt.u32.totalorder %s1190_s30, %s1453_s0 }
  0x1c   : > { %p905_p6 = pnand %p904_p5, %p903_p3  ;;  %p909_p10 = scmp.lt.u32.totalorder %s907_s16, %s902_s7 }
  0x1d   : > { %p911_p12 = scmp.lt.u32.totalorder %s902_s7, %s1190_s30 }
  0x1e   : > { %p906_p7 = pneg %p905_p6  ;;  %p910_p13 = por %p909_p10, %p908_p4 }
  0x20   : > { %p912_p1 = por %p911_p12, %p910_p13 }
  0x22   : > { %p913_p2 = pnand %p912_p1, %p906_p7 }
  0x24   : > { %916 = shalt.err (!%p913_p2)
}
  0x25   : > { %s917_s20 = scalar_lea.vmem %s1192_s4, 128  ;;  %s1050_s26 = smov [#allocation2]  }
  0x26   : > { %p918_p3 = scmp.ne.s32.totalorder %s1192_s4, %s917_s20  ;;  %s922_s27 = sshll.u32 %s1050_s26, 4  ;;  %s923_s27 = int_to_ptr.vmem [resolvable:$false] %s922_s27 }
  0x27   : > { %s924_s28 = scalar_lea.vmem %s923_s27, 256  ;;  %p925_p9 = scmp.lt.s32.totalorder %s1192_s4, %s923_s27 }
  0x28   : > { %p920_p6 = pnand %p918_p3, %p904_p5  ;;  %p926_p4 = scmp.lt.s32.totalorder %s924_s28, %s917_s20 }
  0x2a   : > { %p921_p11 = pneg %p920_p6  ;;  %p927_p10 = por %p926_p4, %p925_p9 }
  0x2c   : > { %p928_p12 = pnand %p927_p10, %p921_p11 }
  0x2e   : > { %931 = shalt.err (!%p928_p12)
}
  0x2f   : > { %744 = dma.hbm_to_vmem [thread:$0]  (!%p1196_p0), %s1190_s30, 128, %s1192_s4, %s136_s6  }
  0x30   : > { %p1463_p1 = scmp.lt.s32.totalorder %s1048_s14, 3  ;;  %p1464_p2 = scmp.ge.s32.totalorder %s1048_s14, 1 }
  0x31   : > { %s732_s3 = smul.u32 40, %s1183_s25  ;;  %s155_s30 = scalar_lea.sflag [#allocation6], %s1183_s25 }
  0x32   : > { %p1232_p7 = pnand %p1464_p2, %p1463_p1  ;;  %s733_s7 = smul.u32 640, %s1044_s13 }
  0x33   : > { %s158_s18 = scalar_lea.vmem [#allocation5], %s732_s3  ;;  %s937_s26 = scalar_lea.hbm %s1454_s1, 1280 }
  0x34   : > { %s1465_s29 = scalar_select %p1232_p7, 1, 0 }
  0x35   : > { %s1241_s16 = scalar_lea.hbm %s1454_s1, %s733_s7  ;;  %s168_s19 = sshll.u32 %s158_s18, 4  ;;  %s169_s19 = int_to_ptr.vmem [resolvable:$true] %s168_s19 }
  0x36   : > { %s932_s4 = scalar_lea.hbm %s1241_s16, 640  ;;  %p938_p3 = scmp.lt.u32.totalorder %s1241_s16, %s1454_s1 }
  0x37   : > { %p933_p9 = scmp.ne.s32.totalorder %s1241_s16, %s932_s4  ;;  %p939_p6 = scmp.lt.u32.totalorder %s937_s26, %s932_s4 }
  0x38   : > { %p941_p10 = scmp.lt.u32.totalorder %s932_s4, %s1241_s16 }
  0x39   : > { %p935_p11 = pnand %p933_p9, %p904_p5  ;;  %p940_p4 = por %p939_p6, %p938_p3 }
  0x3b   : > { %p936_p13 = pneg %p935_p11  ;;  %p942_p12 = por %p941_p10, %p940_p4 }
  0x3d   : > { %p943_p1 = pnand %p942_p12, %p936_p13 }
  0x3f   : > { %946 = shalt.err (!%p943_p1)
}
  0x40   : > { %s947_s25 = scalar_lea.vmem %s169_s19, 640  ;;  %s1051_s3 = smov [#allocation5]  }
  0x41   : > { %p948_p2 = scmp.ne.s32.totalorder %s169_s19, %s947_s25  ;;  %s952_s7 = sshll.u32 %s1051_s3, 4  ;;  %s953_s7 = int_to_ptr.vmem [resolvable:$false] %s952_s7 }
  0x42   : > { %s954_s8 = scalar_lea.vmem %s953_s7, 1280  ;;  %p955_p8 = scmp.lt.s32.totalorder %s169_s19, %s953_s7 }
  0x43   : > { %p950_p9 = pnand %p948_p2, %p904_p5  ;;  %p956_p7 = scmp.lt.s32.totalorder %s954_s8, %s947_s25 }
  0x45   : > { %p951_p11 = pneg %p950_p9  ;;  %p957_p3 = por %p956_p7, %p955_p8 }
  0x47   : > { %p958_p6 = pnand %p957_p3, %p951_p11 }
  0x49   : > { %961 = shalt.err (!%p958_p6)
}
  0x4a   : > { %747 = dma.hbm_to_vmem [thread:$0]  (!%p1196_p0), %s1241_s16, 640, %s169_s19, %s155_s30  }
  0x4b   : > { %p1466_p13 = scmp.ne.s32.totalorder %s1465_s29, 0 }
  0x4c   : > { %s1266_s15 = sand.u32 (!%p1466_p13), 1, %s1032_s10   ;;  %p1467_p5 = scmp.ne.s32.totalorder (!%p1466_p13), %s1459_s21, 0 }
  0x4d   : > { %177 = sbr.rel (%p1466_p13) target bundleno = 1082 (0x43a), region = 28  ;;  %s728_s18 = sshll.u32 (!%p1466_p13), %s1266_s15, 3 }
  0x4e   : > { %s180_s4 = scalar_lea.sflag (!%p1466_p13), [#allocation3], %s1266_s15  ;;  %s183_s6 = scalar_lea.vmem (!%p1466_p13), [#allocation2], %s728_s18 }
  0x54   : > { %1015 = dma.done.wait (%p1467_p5), %s180_s4, 128  }
  0x55   : > { %1017 = vsyncadd (%p1467_p5), %s180_s4, 4294967168  ;;  %s734_s5 = smul.u32 40, %s1266_s15  ;;  %s189_s29 = scalar_lea.sflag [#allocation6], %s1266_s15 }
  0x57   : > { %s1276_s16 = scalar_lea.vmem [#allocation5], %s734_s5 }
  0x58   : > { %1019 = dma.done.wait (%p1467_p5), %s189_s29, 640  }
  0x59   : > { %1021 = vsyncadd (%p1467_p5), %s189_s29, 4294966656  ;;  %v1052_v0 = vmov 32   ;;  %v1053_v1 = vmov 4   ;;  %v1282_v2 = vld [vmem:[%s183_s6] sm:$0xff]  ;;  %v1054_v3 = vmov 60   ;;  %v1055_v4 = vmov 18  }
  0x5a   : > { %854 = vset.pattern.permute.xlu1 %v1052_v0  ;;  %852 = vset.pattern.permute.xlu0 %v1053_v1  ;;  %v1056_v5 = vmov 46   ;;  %v1057_v6 = vmov 6   ;;  %v1058_v7 = vmov 5   ;;  %v1059_v8 = vmov 62   ;;  %v1308_v26 = vld [vmem:[%s1276_s16] sm:$0xff]  ;;  %v1312_v30 = vld [vmem:[%s1276_s16 + $0x10] sm:$0xff] }
  0x5b   : > { %235 = vperm.xlu1 %854, %v1282_v2   ;;  %225 = vperm.xlu0 %852, %v1282_v2   ;;  %v1060_v9 = vmov 19   ;;  %v1061_v10 = vmov 7   ;;  %v1062_v11 = vmov 33   ;;  %v1063_v12 = vmov 21   ;;  %v1315_v31 = vld [vmem:[%s1276_s16 + $0x8] sm:$0xff]  ;;  %v1320_v37 = vld [vmem:[%s1276_s16 + $0x20] sm:$0xff] }
  0x5c   : > { %v1064_v13 = vmov 61   ;;  %v1065_v14 = vmov 35   ;;  %v1066_v15 = vmov 47   ;;  %v1067_v16 = vmov 63   ;;  %v1324_v43 = vld [vmem:[%s1276_s16 + $0x18] sm:$0xff]  ;;  %s729_s21 = sshll.u32 %s1040_s12, 4 }
  0x5d   : > { %v1068_v17 = vmov 20   ;;  %v1069_v18 = vmov 49   ;;  %v1070_v19 = vmov 34   ;;  %v1071_v20 = vmov 22   ;;  %s216_s19 = scalar_lea.vmem [#allocation7], %s1266_s15  ;;  %s1404_s27 = scalar_lea.hbm %s1455_s2, %s729_s21 }
  0x5e   : > { %v1072_v21 = vmov 48   ;;  %v1073_v22 = vmov 36   ;;  %v1074_v23 = vmov 8   ;;  %v1075_v24 = vmov 64   ;;  %s618_s30 = sshll.u32 %s216_s19, 4  ;;  %s605_s28 = scalar_lea.sflag [#allocation4], %s1266_s15  ;;  %s1406_s30 = int_to_ptr.vmem [resolvable:$true] %s618_s30 }
  0x5f   : > { %855 = vset.pattern.permute.xlu1 %v1054_v3  ;;  %853 = vset.pattern.permute.xlu0 %v1055_v4  ;;  %v1076_v25 = vmov 50   ;;  %vm602_vm10 = vcmask 57344   ;;  %s962_s25 = scalar_lea.vmem %s1406_s30, 16  ;;  %p1468_p0 = scmp.ne.s32.totalorder %s1460_s22, 0 }
  0x60   : > { %245 = vperm.xlu1 %855, %v1282_v2   ;;  %230 = vperm.xlu0 %853, %v1282_v2   ;;  %p963_p8 = scmp.ne.s32.totalorder %s1406_s30, %s962_s25  ;;  %s1102_s12 = smov [#allocation7]  }
  0x61   : > { %s966_s3 = sshll.u32 %s1102_s12, 4  ;;  %s967_s3 = int_to_ptr.vmem [resolvable:$false] %s966_s3 }
  0x62   : > { %p964_p7 = pnand %p963_p8, %p1468_p0  ;;  %s968_s7 = scalar_lea.vmem %s967_s3, 32 }
  0x63   : > { %p969_p10 = scmp.lt.s32.totalorder %s1406_s30, %s967_s3  ;;  %p970_p12 = scmp.lt.s32.totalorder %s968_s7, %s962_s25 }
  0x64   : > { %856 = vset.pattern.permute.xlu1 %v1056_v5  ;;  %862 = vset.pattern.permute.xlu0 %v1057_v6  ;;  %p965_p4 = pneg %p964_p7 }
  0x65   : > { %250 = vperm.xlu1 %856, %v1282_v2   ;;  %299 = vperm.xlu0 %862, %v1282_v2   ;;  %p971_p1 = por %p970_p12, %p969_p10 }
  0x67   : > { %p972_p2 = pnand %p971_p1, %p965_p4 }
  0x69   : > { %857 = vset.pattern.permute.xlu1 %v1058_v7  ;;  %865 = vset.pattern.permute.xlu0 %v1059_v8 }
  0x6a   : > { %262 = vperm.xlu1 %857, %v1282_v2   ;;  %319 = vperm.xlu0 %865, %v1282_v2  }
  0x6e   : > { %858 = vset.pattern.permute.xlu1 %v1060_v9  ;;  %867 = vset.pattern.permute.xlu0 %v1061_v10 }
  0x6f   : > { %267 = vperm.xlu1 %858, %v1282_v2   ;;  %336 = vperm.xlu0 %867, %v1282_v2  }
  0x73   : > { %859 = vset.pattern.permute.xlu1 %v1062_v11  ;;  %868 = vset.pattern.permute.xlu0 %v1063_v12 }
  0x74   : > { %272 = vperm.xlu1 %859, %v1282_v2   ;;  %341 = vperm.xlu0 %868, %v1282_v2  }
  0x78   : > { %860 = vset.pattern.permute.xlu1 %v1064_v13  ;;  %869 = vset.pattern.permute.xlu0 %v1065_v14 }
  0x79   : > { %282 = vperm.xlu1 %860, %v1282_v2   ;;  %346 = vperm.xlu0 %869, %v1282_v2  }
  0x7d   : > { %861 = vset.pattern.permute.xlu1 %v1066_v15  ;;  %870 = vset.pattern.permute.xlu0 %v1067_v16 }
  0x7e   : > { %287 = vperm.xlu1 %861, %v1282_v2   ;;  %356 = vperm.xlu0 %870, %v1282_v2  }
  0x82   : > { %863 = vset.pattern.permute.xlu1 %v1068_v17  ;;  %871 = vset.pattern.permute.xlu0 %v1069_v18 }
  0x83   : > { %304 = vperm.xlu1 %863, %v1282_v2   ;;  %361 = vperm.xlu0 %871, %v1282_v2  }
  0x87   : > { %864 = vset.pattern.permute.xlu1 %v1070_v19  ;;  %873 = vset.pattern.permute.xlu0 %v1071_v20 }
  0x88   : > { %309 = vperm.xlu1 %864, %v1282_v2   ;;  %378 = vperm.xlu0 %873, %v1282_v2  }
  0x8c   : > { %866 = vset.pattern.permute.xlu1 %v1072_v21  ;;  %874 = vset.pattern.permute.xlu0 %v1073_v22 }
  0x8d   : > { %324 = vperm.xlu1 %866, %v1282_v2   ;;  %383 = vperm.xlu0 %874, %v1282_v2  }
  0x91   : > { %872 = vset.pattern.permute.xlu1 %v1074_v23  ;;  %876 = vset.pattern.permute.xlu0 %v1076_v25 }
  0x92   : > { %373 = vperm.xlu1 %872, %v1282_v2  }
  0x96   : > { %875 = vset.pattern.permute.xlu1 %v1075_v24 }
  0xda   : > { %v236_v27 = vpop.permute.xlu1 %235  ;;  %v226_v28 = vpop.permute.xlu0 %225 }
  0xdb   : > { %v228_v29 = vsub.f32 %v226_v28, %v1308_v26  ;;  %v238_v34 = vsub.f32 %v236_v27, %v1312_v30 }
  0xdd   : > { %v239_v35 = vmul.f32 %v228_v29, %v228_v29  ;;  %v242_v39 = vmul.f32 %v238_v34, %v238_v34 }
  0xdf   : > { %v246_v32 = vpop.permute.xlu1 %245  ;;  %v231_v33 = vpop.permute.xlu0 %230 }
  0xe0   : > { %v233_v36 = vsub.f32 %v231_v33, %v1315_v31  ;;  %v248_v40 = vadd.f32 %v246_v32, %v1320_v37 }
  0xe2   : > { %v240_v38 = vmul.f32 %v233_v36, %v233_v36  ;;  %v255_v46 = vmul.f32 %v248_v40, %v248_v40 }
  0xe4   : > { %v241_v41 = vadd.f32 %v240_v38, %v239_v35  ;;  %v251_v42 = vpop.permute.xlu1 %250  ;;  %v300_v45 = vpop.permute.xlu0 %299 }
  0xe5   : > { %v253_v48 = vmul.f32 %v251_v42, %v1324_v43  ;;  %v302_v16 = vsub.f32 %v300_v45, %v1308_v26  ;;  %v1077_v45 = vmov 9  }
  0xe6   : > { %v243_v44 = vadd.f32 %v242_v39, %v241_v41 }
  0xe7   : > { %v313_v22 = vmul.f32 %v302_v16, %v302_v16  ;;  %v1086_v16 = vmov 66  }
  0xe8   : > { %v254_v47 = vadd.f32 0.001, %v243_v44 }
  0xe9   : > { %v263_v49 = vpop.permute.xlu1 %262  ;;  %v320_v51 = vpop.permute.xlu0 %319 }
  0xea   : > { %vm256_vm0 = vcmp.lt.f32.partialorder %v254_v47, %v255_v46  ;;  %v265_v54 = vsub.f32 %v263_v49, %v1308_v26  ;;  %v322_v24 = vadd.f32 %v320_v51, %v1320_v37  ;;  %v1078_v46 = vmov 23  }
  0xeb   : > { %v257_v50 = vsel %vm256_vm0, %v253_v48, 0.0  ;;  %v1079_v47 = vmov 37   ;;  %v1080_v48 = vmov 51   ;;  %v1081_v49 = vmov 65  }
  0xec   : > { %258 = vadd.xlane.f32.xlu0 %v257_v50  ;;  %v276_v58 = vmul.f32 %v265_v54, %v265_v54  ;;  %v329_v35 = vmul.f32 %v322_v24, %v322_v24 }
  0xee   : > { %v268_v52 = vpop.permute.xlu1 %267  ;;  %v337_v57 = vpop.permute.xlu0 %336 }
  0xef   : > { %v270_v53 = vsub.f32 %v268_v52, %v1315_v31  ;;  %v339_v6 = vsub.f32 %v337_v57, %v1308_v26 }
  0xf1   : > { %v277_v55 = vmul.f32 %v270_v53, %v270_v53  ;;  %v350_v11 = vmul.f32 %v339_v6, %v339_v6 }
  0xf3   : > { %v273_v56 = vpop.permute.xlu1 %272  ;;  %v278_v60 = vadd.f32 %v277_v55, %v276_v58  ;;  %v342_v1 = vpop.permute.xlu0 %341 }
  0xf4   : > { %v275_v59 = vsub.f32 %v273_v56, %v1312_v30  ;;  %v344_v7 = vsub.f32 %v342_v1, %v1315_v31 }
  0xf6   : > { %v279_v61 = vmul.f32 %v275_v59, %v275_v59  ;;  %v351_v12 = vmul.f32 %v344_v7, %v344_v7 }
  0xf8   : > { %v280_v62 = vadd.f32 %v279_v61, %v278_v60  ;;  %v283_v63 = vpop.permute.xlu1 %282  ;;  %v347_v9 = vpop.permute.xlu0 %346  ;;  %v352_v17 = vadd.f32 %v351_v12, %v350_v11  ;;  %v1082_v12 = vmov 10  }
  0xf9   : > { %v285_v0 = vadd.f32 %v283_v63, %v1320_v37  ;;  %v349_v13 = vsub.f32 %v347_v9, %v1312_v30 }
  0xfa   : > { %v291_v4 = vadd.f32 0.001, %v280_v62 }
  0xfb   : > { %v292_v3 = vmul.f32 %v285_v0, %v285_v0  ;;  %v353_v18 = vmul.f32 %v349_v13, %v349_v13  ;;  %v1083_v13 = vmov 52  }
  0xfd   : > { %v288_v5 = vpop.permute.xlu1 %287  ;;  %vm293_vm1 = vcmp.lt.f32.partialorder %v291_v4, %v292_v3  ;;  %v357_v20 = vpop.permute.xlu0 %356  ;;  %v354_v25 = vadd.f32 %v353_v18, %v352_v17 }
  0xfe   : > { %v290_v8 = vmul.f32 %v288_v5, %v1324_v43  ;;  %v359_v28 = vadd.f32 %v357_v20, %v1320_v37 }
  0xff   : > { %v365_v40 = vadd.f32 0.001, %v354_v25 }
 0x100   : > { %v294_v10 = vsel %vm293_vm1, %v290_v8, 0.0  ;;  %v366_v36 = vmul.f32 %v359_v28, %v359_v28 }
 0x101   : > { %295 = vadd.xlane.f32.xlu1 %v294_v10 }
 0x102   : > { %v305_v14 = vpop.permute.xlu1 %304  ;;  %398 = vperm.xlu0 %876, %v1282_v2   ;;  %v362_v38 = vpop.permute.xlu0 %361  ;;  %vm367_vm3 = vcmp.lt.f32.partialorder %v365_v40, %v366_v36 }
 0x103   : > { %v307_v15 = vsub.f32 %v305_v14, %v1315_v31  ;;  %v364_v41 = vmul.f32 %v362_v38, %v1324_v43  ;;  %v1084_v14 = vmov 24  }
 0x105   : > { %v314_v19 = vmul.f32 %v307_v15, %v307_v15  ;;  %v368_v44 = vsel %vm367_vm3, %v364_v41, 0.0  ;;  %v1085_v15 = vmov 38   ;;  %v1087_v41 = vmov 25  }
 0x106   : > { %877 = vset.pattern.permute.xlu0 %v1077_v45  ;;  %v1090_v45 = vmov 40  }
 0x107   : > { %v310_v21 = vpop.permute.xlu1 %309  ;;  %v315_v27 = vadd.f32 %v314_v19, %v313_v22  ;;  %410 = vperm.xlu0 %877, %v1282_v2   ;;  %v379_v50 = vpop.permute.xlu0 %378 }
 0x108   : > { %v312_v23 = vsub.f32 %v310_v21, %v1312_v30  ;;  %v381_v56 = vsub.f32 %v379_v50, %v1315_v31 }
 0x10a   : > { %v316_v29 = vmul.f32 %v312_v23, %v312_v23  ;;  %v388_v58 = vmul.f32 %v381_v56, %v381_v56 }
 0x10b   : > { %878 = vset.pattern.permute.xlu0 %v1078_v46  ;;  %v1091_v46 = vmov 67  }
 0x10c   : > { %v317_v32 = vadd.f32 %v316_v29, %v315_v27  ;;  %v325_v33 = vpop.permute.xlu1 %324  ;;  %415 = vperm.xlu0 %878, %v1282_v2   ;;  %v384_v52 = vpop.permute.xlu0 %383 }
 0x10d   : > { %v327_v34 = vmul.f32 %v325_v33, %v1324_v43  ;;  %v386_v60 = vsub.f32 %v384_v52, %v1312_v30 }
 0x10e   : > { %v328_v39 = vadd.f32 0.001, %v317_v32 }
 0x10f   : > { %v390_v0 = vmul.f32 %v386_v60, %v386_v60 }
 0x110   : > { %vm330_vm2 = vcmp.lt.f32.partialorder %v328_v39, %v329_v35  ;;  %879 = vset.pattern.permute.xlu0 %v1079_v47  ;;  %v1092_v47 = vmov 53  }
 0x111   : > { %v331_v42 = vsel %vm330_vm2, %v327_v34, 0.0  ;;  %420 = vperm.xlu0 %879, %v1282_v2   ;;  %v374_v51 = vpop.permute.xlu1 %373 }
 0x112   : > { %332 = vadd.xlane.f32.xlu1 %v331_v42  ;;  %v376_v57 = vsub.f32 %v374_v51, %v1308_v26  ;;  %v1088_v42 = vmov 11  }
 0x114   : > { %v387_v59 = vmul.f32 %v376_v57, %v376_v57 }
 0x115   : > { %880 = vset.pattern.permute.xlu0 %v1081_v49 }
 0x116   : > { %369 = vadd.xlane.f32.xlu1 %v368_v44  ;;  %430 = vperm.xlu0 %880, %v1282_v2   ;;  %v389_v63 = vadd.f32 %v388_v58, %v387_v59  ;;  %v1089_v44 = vmov 39  }
 0x118   : > { %v391_v4 = vadd.f32 %v390_v0, %v389_v63 }
 0x11a   : > { %v402_v10 = vadd.f32 0.001, %v391_v4  ;;  %886 = vset.pattern.permute.xlu0 %v1083_v13  ;;  %v1101_v13 = vmov 54  }
 0x127   : > { %393 = vperm.xlu1 %875, %v1282_v2  }
 0x12b   : > { %881 = vset.pattern.permute.xlu1 %v1080_v48  ;;  %v1093_v48 = vmov 55  }
 0x179   : > { %v259_v53 = vpop.xlane.xlu0 %258 }
 0x181   : > { %v399_v5 = vpop.permute.xlu0 %398 }
 0x182   : > { %v401_v8 = vmul.f32 %v399_v5, %v1324_v43 }
 0x186   : > { %v411_v17 = vpop.permute.xlu0 %410 }
 0x187   : > { %v413_v19 = vsub.f32 %v411_v17, %v1308_v26 }
 0x189   : > { %v424_v22 = vmul.f32 %v413_v19, %v413_v19 }
 0x18b   : > { %v416_v18 = vpop.permute.xlu0 %415 }
 0x18c   : > { %v418_v20 = vsub.f32 %v416_v18, %v1315_v31 }
 0x18e   : > { %v296_v54 = vpop.xlane.xlu1 %295  ;;  %v425_v23 = vmul.f32 %v418_v20, %v418_v20 }
 0x18f   : > { %v297_v55 = vadd.f32 %v296_v54, %v259_v53 }
 0x190   : > { %v421_v21 = vpop.permute.xlu0 %420  ;;  %v426_v25 = vadd.f32 %v425_v23, %v424_v22 }
 0x191   : > { %v423_v24 = vsub.f32 %v421_v21, %v1312_v30 }
 0x193   : > { %v427_v27 = vmul.f32 %v423_v24, %v423_v24 }
 0x195   : > { %v431_v28 = vpop.permute.xlu0 %430  ;;  %v428_v29 = vadd.f32 %v427_v27, %v426_v25 }
 0x196   : > { %v433_v32 = vadd.f32 %v431_v28, %v1320_v37 }
 0x197   : > { %v439_v36 = vadd.f32 0.001, %v428_v29 }
 0x198   : > { %v440_v35 = vmul.f32 %v433_v32, %v433_v32 }
 0x19a   : > { %vm441_vm5 = vcmp.lt.f32.partialorder %v439_v36, %v440_v35 }
 0x19f   : > { %v333_v61 = vpop.xlane.xlu1 %332 }
 0x1a0   : > { %v334_v62 = vadd.f32 %v333_v61, %v297_v55 }
 0x1a3   : > { %v370_v1 = vpop.xlane.xlu1 %369 }
 0x1a4   : > { %v371_v3 = vadd.f32 %v370_v1, %v334_v62 }
 0x1a7   : > { %v394_v6 = vpop.permute.xlu1 %393 }
 0x1a8   : > { %v396_v7 = vadd.f32 %v394_v6, %v1320_v37  ;;  %v1094_v6 = vmov 12  }
 0x1aa   : > { %v403_v9 = vmul.f32 %v396_v7, %v396_v7  ;;  %v1095_v7 = vmov 26  }
 0x1ac   : > { %vm404_vm4 = vcmp.lt.f32.partialorder %v402_v10, %v403_v9  ;;  %v1097_v9 = vmov 27   ;;  %v1098_v10 = vmov 41  }
 0x1ad   : > { %v405_v11 = vsel %vm404_vm4, %v401_v8, 0.0  ;;  %v1096_v8 = vmov 13  }
 0x1ae   : > { %406 = vadd.xlane.f32.xlu1 %v405_v11  ;;  %v1099_v11 = vmov 68  }
 0x1bf   : > { %435 = vperm.xlu1 %881, %v1282_v2  }
 0x1c3   : > { %882 = vset.pattern.permute.xlu1 %v1082_v12  ;;  %v1100_v12 = vmov 69  }
 0x1c4   : > { %447 = vperm.xlu1 %882, %v1282_v2  }
 0x1c8   : > { %883 = vset.pattern.permute.xlu1 %v1084_v14 }
 0x1c9   : > { %452 = vperm.xlu1 %883, %v1282_v2  }
 0x1cd   : > { %884 = vset.pattern.permute.xlu1 %v1085_v15 }
 0x1ce   : > { %457 = vperm.xlu1 %884, %v1282_v2  }
 0x1d2   : > { %885 = vset.pattern.permute.xlu1 %v1086_v16 }
 0x1d3   : > { %467 = vperm.xlu1 %885, %v1282_v2  }
 0x1d7   : > { %887 = vset.pattern.permute.xlu1 %v1088_v42 }
 0x23b   : > { %v407_v33 = vpop.xlane.xlu1 %406 }
 0x23c   : > { %v408_v34 = vadd.f32 %v407_v33, %v371_v3 }
 0x23f   : > { %v436_v38 = vpop.permute.xlu1 %435 }
 0x240   : > { %v438_v39 = vmul.f32 %v436_v38, %v1324_v43 }
 0x242   : > { %v442_v40 = vsel %vm441_vm5, %v438_v39, 0.0 }
 0x243   : > { %443 = vadd.xlane.f32.xlu0 %v442_v40  ;;  %v448_v49 = vpop.permute.xlu1 %447 }
 0x244   : > { %v450_v51 = vsub.f32 %v448_v49, %v1308_v26 }
 0x246   : > { %v461_v54 = vmul.f32 %v450_v51, %v450_v51 }
 0x248   : > { %v453_v50 = vpop.permute.xlu1 %452 }
 0x249   : > { %v455_v52 = vsub.f32 %v453_v50, %v1315_v31 }
 0x24b   : > { %v462_v55 = vmul.f32 %v455_v52, %v455_v52 }
 0x24d   : > { %v458_v53 = vpop.permute.xlu1 %457  ;;  %v463_v57 = vadd.f32 %v462_v55, %v461_v54 }
 0x24e   : > { %v460_v56 = vsub.f32 %v458_v53, %v1312_v30 }
 0x250   : > { %v464_v58 = vmul.f32 %v460_v56, %v460_v56 }
 0x252   : > { %v468_v59 = vpop.permute.xlu1 %467  ;;  %v465_v62 = vadd.f32 %v464_v58, %v463_v57 }
 0x253   : > { %v470_v63 = vadd.f32 %v468_v59, %v1320_v37 }
 0x254   : > { %v476_v1 = vadd.f32 0.001, %v465_v62 }
 0x255   : > { %v477_v0 = vmul.f32 %v470_v63, %v470_v63 }
 0x257   : > { %vm478_vm6 = vcmp.lt.f32.partialorder %v476_v1, %v477_v0 }
 0x259   : > { %472 = vperm.xlu0 %886, %v1282_v2  }
 0x25d   : > { %888 = vset.pattern.permute.xlu0 %v1087_v41 }
 0x25e   : > { %489 = vperm.xlu0 %888, %v1282_v2  }
 0x262   : > { %889 = vset.pattern.permute.xlu0 %v1089_v44 }
 0x263   : > { %494 = vperm.xlu0 %889, %v1282_v2  }
 0x267   : > { %892 = vset.pattern.permute.xlu0 %v1090_v45 }
 0x268   : > { %531 = vperm.xlu0 %892, %v1282_v2  }
 0x26c   : > { %895 = vset.pattern.permute.xlu0 %v1091_v46 }
 0x26d   : > { %504 = vperm.xlu0 %895, %v1282_v2  }
 0x271   : > { %898 = vset.pattern.permute.xlu0 %v1092_v47 }
 0x272   : > { %509 = vperm.xlu0 %898, %v1282_v2  }
 0x276   : > { %901 = vset.pattern.permute.xlu0 %v1093_v48 }
 0x277   : > { %583 = vperm.xlu0 %901, %v1282_v2  }
 0x2d0   : > { %v444_v60 = vpop.xlane.xlu0 %443 }
 0x2d1   : > { %v445_v61 = vadd.f32 %v444_v60, %v408_v34 }
 0x2d8   : > { %v473_v3 = vpop.permute.xlu0 %472 }
 0x2d9   : > { %v475_v4 = vmul.f32 %v473_v3, %v1324_v43 }
 0x2db   : > { %v479_v5 = vsel %vm478_vm6, %v475_v4, 0.0 }
 0x2dc   : > { %480 = vadd.xlane.f32.xlu1 %v479_v5 }
 0x2dd   : > { %v490_v14 = vpop.permute.xlu0 %489 }
 0x2de   : > { %v492_v18 = vsub.f32 %v490_v14, %v1315_v31 }
 0x2e0   : > { %v499_v23 = vmul.f32 %v492_v18, %v492_v18 }
 0x2e2   : > { %v495_v15 = vpop.permute.xlu0 %494 }
 0x2e3   : > { %v497_v20 = vsub.f32 %v495_v15, %v1312_v30 }
 0x2e5   : > { %v501_v25 = vmul.f32 %v497_v20, %v497_v20 }
 0x2e7   : > { %v532_v16 = vpop.permute.xlu0 %531 }
 0x2e8   : > { %v534_v49 = vsub.f32 %v532_v16, %v1312_v30 }
 0x2ea   : > { %v538_v56 = vmul.f32 %v534_v49, %v534_v49 }
 0x2ec   : > { %v505_v21 = vpop.permute.xlu0 %504 }
 0x2ed   : > { %484 = vperm.xlu1 %887, %v1282_v2   ;;  %v507_v28 = vadd.f32 %v505_v21, %v1320_v37 }
 0x2ef   : > { %v514_v33 = vmul.f32 %v507_v28, %v507_v28 }
 0x2f1   : > { %890 = vset.pattern.permute.xlu1 %v1094_v6  ;;  %v510_v32 = vpop.permute.xlu0 %509 }
 0x2f2   : > { %521 = vperm.xlu1 %890, %v1282_v2   ;;  %v512_v35 = vmul.f32 %v510_v32, %v1324_v43 }
 0x2f6   : > { %891 = vset.pattern.permute.xlu1 %v1095_v7  ;;  %v584_v60 = vpop.permute.xlu0 %583 }
 0x2f7   : > { %526 = vperm.xlu1 %891, %v1282_v2   ;;  %v586_v63 = vmul.f32 %v584_v60, %v1324_v43 }
 0x2fb   : > { %893 = vset.pattern.permute.xlu1 %v1096_v8  ;;  %v595_v8 = vlaneseq }
 0x2fc   : > { %558 = vperm.xlu1 %893, %v1282_v2  }
 0x300   : > { %894 = vset.pattern.permute.xlu1 %v1097_v9  ;;  %v596_v9 = vand.u32 127, %v595_v8 }
 0x301   : > { %563 = vperm.xlu1 %894, %v1282_v2  }
 0x305   : > { %896 = vset.pattern.permute.xlu1 %v1098_v10  ;;  %v598_v10 = vshrl.u32 %v595_v8, 7 }
 0x306   : > { %568 = vperm.xlu1 %896, %v1282_v2  }
 0x30a   : > { %897 = vset.pattern.permute.xlu1 %v1099_v11 }
 0x30b   : > { %541 = vperm.xlu1 %897, %v1282_v2  }
 0x30f   : > { %899 = vset.pattern.permute.xlu1 %v1100_v12 }
 0x310   : > { %578 = vperm.xlu1 %899, %v1282_v2  }
 0x314   : > { %900 = vset.pattern.permute.xlu1 %v1101_v13  ;;  %v599_v13 = vsub.s32 %v596_v9, %v598_v10 }
 0x315   : > { %546 = vperm.xlu1 %900, %v1282_v2  }
 0x369   : > { %v481_v17 = vpop.xlane.xlu1 %480 }
 0x36a   : > { %v482_v19 = vadd.f32 %v481_v17, %v445_v61 }
 0x36d   : > { %v485_v22 = vpop.permute.xlu1 %484 }
 0x36e   : > { %v487_v24 = vsub.f32 %v485_v22, %v1308_v26 }
 0x370   : > { %v498_v27 = vmul.f32 %v487_v24, %v487_v24 }
 0x371   : > { %v522_v29 = vpop.permute.xlu1 %521 }
 0x372   : > { %v500_v2 = vadd.f32 %v499_v23, %v498_v27  ;;  %v524_v46 = vsub.f32 %v522_v29, %v1308_v26 }
 0x374   : > { %v502_v34 = vadd.f32 %v501_v25, %v500_v2  ;;  %v535_v52 = vmul.f32 %v524_v46, %v524_v46 }
 0x376   : > { %v527_v36 = vpop.permute.xlu1 %526  ;;  %v513_v38 = vadd.f32 0.001, %v502_v34 }
 0x377   : > { %v529_v42 = vsub.f32 %v527_v36, %v1315_v31 }
 0x378   : > { %vm515_vm7 = vcmp.lt.f32.partialorder %v513_v38, %v514_v33 }
 0x379   : > { %v516_v39 = vsel %vm515_vm7, %v512_v35, 0.0  ;;  %v536_v50 = vmul.f32 %v529_v42, %v529_v42 }
 0x37a   : > { %517 = vadd.xlane.f32.xlu1 %v516_v39 }
 0x37b   : > { %v559_v40 = vpop.permute.xlu1 %558  ;;  %v537_v57 = vadd.f32 %v536_v50, %v535_v52 }
 0x37c   : > { %v561_v47 = vsub.f32 %v559_v40, %v1308_v26 }
 0x37d   : > { %v539_v62 = vadd.f32 %v538_v56, %v537_v57 }
 0x37e   : > { %v572_v53 = vmul.f32 %v561_v47, %v561_v47 }
 0x37f   : > { %v550_v4 = vadd.f32 0.001, %v539_v62 }
 0x380   : > { %v564_v41 = vpop.permute.xlu1 %563 }
 0x381   : > { %v566_v44 = vsub.f32 %v564_v41, %v1315_v31 }
 0x383   : > { %v573_v51 = vmul.f32 %v566_v44, %v566_v44 }
 0x385   : > { %v569_v45 = vpop.permute.xlu1 %568  ;;  %v574_v58 = vadd.f32 %v573_v51, %v572_v53 }
 0x386   : > { %v571_v48 = vsub.f32 %v569_v45, %v1312_v30 }
 0x388   : > { %v575_v54 = vmul.f32 %v571_v48, %v571_v48 }
 0x38a   : > { %v542_v55 = vpop.permute.xlu1 %541  ;;  %v576_v59 = vadd.f32 %v575_v54, %v574_v58 }
 0x38b   : > { %v544_v31 = vadd.f32 %v542_v55, %v1320_v37 }
 0x38c   : > { %v587_v1 = vadd.f32 0.001, %v576_v59 }
 0x38d   : > { %v551_v30 = vmul.f32 %v544_v31, %v544_v31 }
 0x38f   : > { %v579_v61 = vpop.permute.xlu1 %578  ;;  %vm552_vm9 = vcmp.lt.f32.partialorder %v550_v4, %v551_v30 }
 0x390   : > { %v581_v26 = vadd.f32 %v579_v61, %v1320_v37 }
 0x392   : > { %v588_v0 = vmul.f32 %v581_v26, %v581_v26 }
 0x394   : > { %v547_v3 = vpop.permute.xlu1 %546  ;;  %vm589_vm8 = vcmp.lt.f32.partialorder %v587_v1, %v588_v0 }
 0x395   : > { %v549_v5 = vmul.f32 %v547_v3, %v1324_v43  ;;  %v590_v6 = vsel %vm589_vm8, %v586_v63, 0.0 }
 0x396   : > { %591 = vadd.xlane.f32.xlu1 %v590_v6 }
 0x397   : > { %v553_v7 = vsel %vm552_vm9, %v549_v5, 0.0 }
 0x398   : > { %554 = vadd.xlane.f32.xlu0 %v553_v7 }
 0x407   : > { %v518_v37 = vpop.xlane.xlu1 %517 }
 0x408   : > { %v519_v11 = vadd.f32 %v518_v37, %v482_v19 }
 0x423   : > { %v592_v15 = vpop.xlane.xlu1 %591 }
 0x425   : > { %v555_v12 = vpop.xlane.xlu0 %554 }
 0x426   : > { %v556_v14 = vadd.f32 %v555_v12, %v519_v11 }
 0x428   : > { %v593_v43 = vadd.f32 %v592_v15, %v556_v14 }
 0x42a   : > { %v600_v16 = vrot.slane %v593_v43, %v599_v13 }
 0x42c   : > { %603 = vst.msk [vmem:[%s216_s19] sm:$0x1] %vm602_vm10, %v600_v16 }
 0x42d   : > { %975 = shalt.err (!%p972_p2)
}
 0x42e   : > { %s976_s8 = scalar_lea.hbm %s1404_s27, 16  ;;  %s980_s4 = scalar_lea.hbm %s1455_s2, 32 }
 0x42f   : > { %p977_p9 = scmp.ne.s32.totalorder %s1404_s27, %s976_s8  ;;  %p981_p6 = scmp.lt.u32.totalorder %s1404_s27, %s1455_s2 }
 0x430   : > { %p982_p13 = scmp.lt.u32.totalorder %s980_s4, %s976_s8  ;;  %p984_p8 = scmp.lt.u32.totalorder %s976_s8, %s1404_s27 }
 0x431   : > { %p978_p11 = pnand %p977_p9, %p1468_p0 }
 0x432   : > { %p983_p5 = por %p982_p13, %p981_p6 }
 0x433   : > { %p979_p3 = pneg %p978_p11 }
 0x434   : > { %p985_p7 = por %p984_p8, %p983_p5 }
 0x436   : > { %p986_p4 = pnand %p985_p7, %p979_p3 }
 0x438   : > { %989 = shalt.err (!%p986_p4)
}
 0x439   : > { %739 = dma.vmem_to_hbm [thread:$0]  (%p1468_p0), %s1406_s30, 16, %s1404_s27, %s605_s28  }
 0x43a PF: > { %s630_s29 = sand.u32 1, %s1028_s9   ;;  %p1469_p10 = scmp.ne.s32.totalorder %s1461_s24, 0 }
 0x43b   : > { %p1470_p12 = scmp.ge.s32.totalorder %s1048_s14, 2  ;;  %s631_s16 = scalar_lea.sflag [#allocation4], %s630_s29 }
 0x43d   : > { %p749_p1 = pnand %p1470_p12, %p1469_p10 }
 0x43f   : > { %1023 = dma.done.wait (!%p749_p1), %s631_s16, 16  }
 0x440   : > { %1025 = vsyncadd (!%p749_p1), %s631_s16, 4294967280  ;;  %s21_s14 = sadd.s32 1, %s1048_s14   ;;  %s1471_s9 = smov %s1032_s10 }
 0x441   : > { %p18_p2 = scmp.ge.s32.totalorder %s21_s14, 4   ;;  %s1472_s10 = smov %s1036_s11 }
 0x442   : > { %s1473_s11 = smov %s1174_s23  ;;  %s1474_s12 = smov %s1044_s13 }
 0x443   : > { %s1475_s13 = smov %s1477_s17  ;;  %20 = sbr.rel (!%p18_p2) target bundleno = 8 (0x8), region = 86 }
 0x44a   :  { %635 = vsyncpa [#allocation3], 1 }
 0x44b   :  { %637 = vsyncpa [#allocation3 + $0x1], 1 }
 0x44c   :  { %638 = vsyncpa [#allocation6], 1 }
 0x44d   :  { %640 = vsyncpa [#allocation6 + $0x1], 1 }
 0x44e   :  { %641 = vsyncpa [#allocation4], 1 }
 0x44f   :  { %643 = vsyncpa [#allocation4 + $0x1], 1 }

</bundles_post_ra>
